<compile_context>
chip_gen: v6e
topology: v6e:2x2x1
jax: 0.10.0
libtpu: 0.0.40
codegen_flags: <defaults>
</compile_context>

<pallas_src>
import functools
import math

import jax
import jax.numpy as jnp
from jax import lax
from jax.experimental import pallas as pl
from jax.experimental.pallas import tpu as pltpu

BN_EPS = 1e-5
OUT_DTYPE = jnp.bfloat16              # HBM storage dtype for fc1 / logits
MAX_HEADS_PER_STEP = 4                # Bp cap (amortize grid-step overhead)
VMEM_STEP_BUDGET = 24 * 1024 * 1024   # per-step working-set budget (v7x-safe)
VMEM_LIMIT_BYTES = 32 * 1024 * 1024   # explicit scoped-VMEM limit


def round_up(x, m):
    return (x + m - 1) // m * m


# -----------------------------------------------------------------------------
# Tile-size selection (static Python, derived from padded shapes).
# -----------------------------------------------------------------------------
def _step_vmem_bytes(bp, n_pad, cs_pad, inter_pad, tk):
    """Per-grid-step VMEM: double-buffered in/out blocks + bn scratch."""
    out_itm = jnp.dtype(OUT_DTYPE).itemsize
    ins = bp * (n_pad * cs_pad * 2 + cs_pad * inter_pad * 2
                + 8 * inter_pad * 4 + inter_pad * tk * 2)
    outs = bp * (n_pad * inter_pad + n_pad * tk) * out_itm
    scratch = bp * n_pad * inter_pad * 2
    return 2 * (ins + outs) + scratch


def choose_tk(k_pad, n_pad, cs_pad, inter_pad):
    """Largest multiple-of-128 class tile dividing k_pad that fits the budget."""
    for t in range(k_pad, 127, -128):
        if k_pad % t == 0 and _step_vmem_bytes(
                1, n_pad, cs_pad, inter_pad, t) <= VMEM_STEP_BUDGET:
            return t
    return 128


def choose_bp(p_group, n_pad, cs_pad, inter_pad, tk):
    """Largest head count per step that divides the group and fits the budget."""
    best = 1
    for bp in range(2, min(MAX_HEADS_PER_STEP, p_group) + 1):
        if (p_group % bp == 0 and
                _step_vmem_bytes(bp, n_pad, cs_pad, inter_pad, tk)
                <= VMEM_STEP_BUDGET):
            best = bp
    return best


# -----------------------------------------------------------------------------
# Pallas kernel: one grid step == `bp` BNNecks (fc1 -> BatchNorm1d -> fc2) on
# pre-pooled features; grid axis 1 tiles the class dimension.
# -----------------------------------------------------------------------------
def bnneck_group_kernel(pooled_ref, w1_ref, bgb_ref, w2_ref,
                        fc1_ref, logit_ref, bn_ref,
                        *, n_valid, bp, shared_pool):
    # pooled_ref: (bp|1, N_pad, Cs_pad) bf16   (1 when shared_pool: global pool)
    # w1_ref    : (bp, Cs_pad, inter_pad) bf16
    # bgb_ref   : (bp, 3, inter_pad) f32   rows = [fc1 bias, BN gamma, BN beta]
    # w2_ref    : (bp, inter_pad, TK) bf16
    # fc1_ref   : (bp, N_pad, inter_pad) OUT_DTYPE
    # logit_ref : (bp, N_pad, TK) OUT_DTYPE
    # bn_ref    : VMEM scratch (bp, N_pad, inter_pad) bf16 -- normalized
    #             activations computed at k == 0, reused for every class tile.
    k_idx = pl.program_id(1)

    @pl.when(k_idx == 0)
    def _fc1_and_bn():
        n_pad = fc1_ref.shape[1]
        # Mask so zero-padded batch rows never corrupt the BN statistics.
        row_valid = (lax.broadcasted_iota(jnp.int32, (n_pad, 1), 0)
                     < n_valid).astype(jnp.float32)
        inv_n = 1.0 / float(n_valid)
        pooled_shared = pooled_ref[0] if shared_pool else None
        for b in range(bp):
            pooled = pooled_shared if shared_pool else pooled_ref[b]
            # fc1 pre-activation WITHOUT bias (BN is shift-invariant); MXU
            # bf16 x bf16 with f32 accumulation.
            z = jnp.dot(pooled, w1_ref[b], preferred_element_type=jnp.float32)
            bgb = bgb_ref[b]
            b1, gamma, beta = bgb[0:1], bgb[1:2], bgb[2:3]
            # Batch statistics (biased variance) over the REAL rows only.
            mu = jnp.sum(z * row_valid, axis=0, keepdims=True) * inv_n
            diff = (z - mu) * row_valid
            var = jnp.sum(diff * diff, axis=0, keepdims=True) * inv_n
            scale = gamma * lax.rsqrt(var + BN_EPS)     # folded BN affine
            shift = beta - mu * scale
            bn_ref[b] = (z * scale + shift).astype(jnp.bfloat16)
            fc1_ref[b] = (z + b1).astype(fc1_ref.dtype)

    # fc2 (no bias) on the current class tile, for every head in the block.
    for b in range(bp):
        logit_ref[b] = jnp.dot(bn_ref[b], w2_ref[b],
                               preferred_element_type=jnp.float32
                               ).astype(logit_ref.dtype)


def run_bnneck_group(pooled, w1, bgb, w2, *, n_valid, bp, tk, shared_pool):
    """pooled: (P, N_pad, Cs_pad) bf16 (or (1, N_pad, Cs_pad) if shared_pool);
    w1: (P, Cs_pad, inter_pad) bf16; bgb: (P, 3, inter_pad) f32;
    w2: (P, inter_pad, K_pad) bf16."""
    p_total, cs_pad, inter_pad = w1.shape
    n_pad = pooled.shape[1]
    k_pad = w2.shape[2]
    assert p_total % bp == 0 and k_pad % tk == 0
    num_p, num_k = p_total // bp, k_pad // tk

    if shared_pool:
        # All heads reuse the single global-pool slab: constant block index
        # means Pallas keeps the tile VMEM-resident (no re-DMA).
        pooled_spec = pl.BlockSpec((1, n_pad, cs_pad), lambda p, k: (0, 0, 0))
    else:
        pooled_spec = pl.BlockSpec((bp, n_pad, cs_pad), lambda p, k: (p, 0, 0))

    kernel = functools.partial(bnneck_group_kernel, n_valid=n_valid, bp=bp,
                               shared_pool=shared_pool)
    out_itm = jnp.dtype(OUT_DTYPE).itemsize
    cost = pl.CostEstimate(
        flops=2 * p_total * n_pad * (cs_pad * inter_pad + inter_pad * k_pad),
        transcendentals=p_total * inter_pad,
        bytes_accessed=(pooled.size * pooled.dtype.itemsize
                        + w1.size * w1.dtype.itemsize
                        + bgb.size * bgb.dtype.itemsize
                        + w2.size * w2.dtype.itemsize
                        + p_total * n_pad * (inter_pad + k_pad) * out_itm))

    return pl.pallas_call(
        kernel,
        out_shape=(
            jax.ShapeDtypeStruct((p_total, n_pad, inter_pad), OUT_DTYPE),
            jax.ShapeDtypeStruct((p_total, n_pad, k_pad), OUT_DTYPE),
        ),
        grid=(num_p, num_k),
        in_specs=[
            pooled_spec,
            pl.BlockSpec((bp, cs_pad, inter_pad), lambda p, k: (p, 0, 0)),
            pl.BlockSpec((bp, 3, inter_pad), lambda p, k: (p, 0, 0)),
            pl.BlockSpec((bp, inter_pad, tk), lambda p, k: (p, 0, k)),
        ],
        out_specs=[
            pl.BlockSpec((bp, n_pad, inter_pad), lambda p, k: (p, 0, 0)),
            pl.BlockSpec((bp, n_pad, tk), lambda p, k: (p, 0, k)),
        ],
        scratch_shapes=[pltpu.VMEM((bp, n_pad, inter_pad), jnp.bfloat16)],
        compiler_params=pltpu.CompilerParams(
            dimension_semantics=("parallel", "arbitrary"),
            vmem_limit_bytes=VMEM_LIMIT_BYTES),
        cost_estimate=cost,
    )(pooled, w1, bgb, w2)


# -----------------------------------------------------------------------------
# Wrapper glue (XLA): single-pass pooling, head grouping, padding, packing.
# -----------------------------------------------------------------------------
def compute_all_pooled(x, splits):
    """Read x once; derive every split's per-part pooled features and the
    global pooled features from a single fine-grained spatial pool."""
    N, C, H, W = x.shape
    f1 = functools.reduce(math.lcm, [s[1] for s in splits], 1)
    f2 = functools.reduce(math.lcm, [s[2] for s in splits], 1)
    sp = x.reshape(N, C, f1, H // f1, f2, W // f2).mean(axis=(3, 5))

    part_pooled = []
    for (s0, s1, s2) in splits:
        cs = C // s0
        g = sp.reshape(N, C, s1, f1 // s1, s2, f2 // s2).mean(axis=(3, 5))
        g = g.reshape(N, s0, cs, s1, s2)
        g = jnp.transpose(g, (1, 3, 4, 0, 2))       # (s0, s1, s2, N, cs)
        part_pooled.append(g.reshape(s0 * s1 * s2, N, cs))
    global_pooled = sp.mean(axis=(2, 3))            # (N, C)
    return part_pooled, global_pooled


def group_heads(splits, in_dim):
    """Static bookkeeping: group part heads by their real input width
    Cs = in_dim // s0.  Returns {cs: [(global_idx, split_idx, local_idx)]}
    preserving the module's head ordering inside each group."""
    groups = {}
    gidx = 0
    for si, (s0, s1, s2) in enumerate(splits):
        cs = in_dim // s0
        for li in range(s0 * s1 * s2):
            groups.setdefault(cs, []).append((gidx, si, li))
            gidx += 1
    return groups


def prepare_packed_params(splits, part_params, triplet_params,
                          in_dim, inter_dim, num_classes):
    """Pack BNNeck parameters per contraction-width group (parts) and for the
    triplet branches, zero-padded only to their own lane-dense widths."""
    inter_pad = round_up(inter_dim, 128)
    k_pad = round_up(num_classes, 128)

    groups = group_heads(splits, in_dim)
    packed_groups = {}
    for cs, heads in groups.items():
        cs_pad = round_up(cs, 128)
        w1s, bgbs, w2s = [], [], []
        for (_, si, li) in heads:
            w1, b1, gamma, beta, w2 = (q[li] for q in part_params[si])
            w1s.append(jnp.pad(w1, ((0, cs_pad - cs),
                                    (0, inter_pad - inter_dim))))
            bgbs.append(jnp.pad(jnp.concatenate([b1, gamma, beta], axis=0),
                                ((0, 0), (0, inter_pad - inter_dim))))
            w2s.append(jnp.pad(w2, ((0, inter_pad - inter_dim),
                                    (0, k_pad - num_classes))))
        packed_groups[cs] = (jnp.stack(w1s).astype(jnp.bfloat16),
                             jnp.stack(bgbs),                 # f32 for BN math
                             jnp.stack(w2s).astype(jnp.bfloat16))

    tw1, tb1, tg, tbeta, tw2 = triplet_params
    c_pad = round_up(in_dim, 128)
    w1_t = jnp.pad(tw1, ((0, 0), (0, c_pad - in_dim),
                         (0, inter_pad - inter_dim))).astype(jnp.bfloat16)
    bgb_t = jnp.pad(jnp.concatenate([tb1, tg, tbeta], axis=1),
                    ((0, 0), (0, 0), (0, inter_pad - inter_dim)))
    w2_t = jnp.pad(tw2, ((0, 0), (0, inter_pad - inter_dim),
                         (0, k_pad - num_classes))).astype(jnp.bfloat16)
    return packed_groups, (w1_t, bgb_t, w2_t)


def part_based_forward(x, splits, packed, inter_dim, num_classes):
    """Returns (logits_pack, triplet_pack): lists of (fc1, logits) pairs in
    the same order as the PyTorch module's outputs."""
    packed_groups, packed_triplet = packed
    N, C, H, W = x.shape
    n_pad = round_up(N, 8)
    inter_pad = round_up(inter_dim, 128)
    k_pad = round_up(num_classes, 128)

    part_pooled_list, global_pooled = compute_all_pooled(x, splits)
    groups = group_heads(splits, C)
    n_parts = sum(s[0] * s[1] * s[2] for s in splits)
    logits_pack = [None] * n_parts

    # Part heads: one fused pallas_call per contraction-width group.
    for cs, heads in groups.items():
        cs_pad = round_up(cs, 128)
        w1_g, bgb_g, w2_g = packed_groups[cs]
        pooled_g = jnp.stack([part_pooled_list[si][li]
                              for (_, si, li) in heads])        # (Pg, N, cs)
        pooled_g = jnp.pad(pooled_g, ((0, 0), (0, n_pad - N),
                                      (0, cs_pad - cs))).astype(jnp.bfloat16)
        tk = choose_tk(k_pad, n_pad, cs_pad, inter_pad)
        bp = choose_bp(len(heads), n_pad, cs_pad, inter_pad, tk)
        fc1_g, logits_g = run_bnneck_group(pooled_g, w1_g, bgb_g, w2_g,
                                           n_valid=N, bp=bp, tk=tk,
                                           shared_pool=False)
        for j, (gidx, _, _) in enumerate(heads):
            logits_pack[gidx] = (fc1_g[j, :N, :inter_dim],
                                 logits_g[j, :N, :num_classes])

    # Triplet heads: single shared global-pool slab, fetched once.
    c_pad = round_up(C, 128)
    w1_t, bgb_t, w2_t = packed_triplet
    pooled_t = jnp.pad(global_pooled,
                       ((0, n_pad - N), (0, c_pad - C)))[None].astype(jnp.bfloat16)
    n_trip = len(splits)
    tk_t = choose_tk(k_pad, n_pad, c_pad, inter_pad)
    bp_t = choose_bp(n_trip, n_pad, c_pad, inter_pad, tk_t)
    fc1_t, logits_t = run_bnneck_group(pooled_t, w1_t, bgb_t, w2_t,
                                       n_valid=N, bp=bp_t, tk=tk_t,
                                       shared_pool=True)
    triplet_pack = [(fc1_t[i, :N, :inter_dim], logits_t[i, :N, :num_classes])
                    for i in range(n_trip)]
    return logits_pack, triplet_pack


# -----------------------------------------------------------------------------
# Parameter construction (mirrors BNNeck.__init__ structure).
# -----------------------------------------------------------------------------
def init_bnneck_params(key, in_dim, inter_dim, num_classes):
    k1, k2, k3, k4, k5 = jax.random.split(key, 5)
    w1 = jax.random.normal(k1, (in_dim, inter_dim), jnp.float32) * (float(in_dim) ** -0.5)
    b1 = 0.1 * jax.random.normal(k2, (1, inter_dim), jnp.float32)
    gamma = 1.0 + 0.1 * jax.random.normal(k3, (1, inter_dim), jnp.float32)
    beta = 0.1 * jax.random.normal(k4, (1, inter_dim), jnp.float32)
    w2 = jax.random.normal(k5, (inter_dim, num_classes), jnp.float32) * (float(inter_dim) ** -0.5)
    return w1, b1, gamma, beta, w2


def stack_params(param_list):
    return tuple(jnp.stack(p, axis=0) for p in zip(*param_list))


# -----------------------------------------------------------------------------
# Pure-JAX reference (direct chunk pooling; bf16 matmul operands like kernel).
# -----------------------------------------------------------------------------
def make_chunks(x, split):
    s0, s1, s2 = split
    N, C, H, W = x.shape
    cs, hs, ws = C // s0, H // s1, W // s2
    xr = x.reshape(N, s0, cs, s1, hs, s2, ws)
    xr = jnp.transpose(xr, (1, 3, 5, 0, 2, 4, 6))
    return xr.reshape(s0 * s1 * s2, N, cs, hs * ws)


def bnneck_ref(feat, w1, b1, gamma, beta, w2):
    fc1 = jnp.dot(feat.astype(jnp.bfloat16), w1.astype(jnp.bfloat16),
                  preferred_element_type=jnp.float32) + b1[0]
    mu = fc1.mean(0, keepdims=True)
    var = ((fc1 - mu) ** 2).mean(0, keepdims=True)
    bn = (fc1 - mu) * lax.rsqrt(var + BN_EPS) * gamma[0] + beta[0]
    logits = jnp.dot(bn.astype(jnp.bfloat16), w2.astype(jnp.bfloat16),
                     preferred_element_type=jnp.float32)
    return fc1, logits


def part_based_ref(x, splits, part_params, triplet_params):
    logits_pack = []
    for split, params in zip(splits, part_params):
        xc = make_chunks(x, split)
        pooled = xc.mean(-1)
        for p in range(pooled.shape[0]):
            logits_pack.append(bnneck_ref(pooled[p], *(q[p] for q in params)))
    gpool = x.mean((2, 3))
    triplet_pack = [bnneck_ref(gpool, *(q[i] for q in triplet_params))
                    for i in range(triplet_params[0].shape[0])]
    return logits_pack, triplet_pack


# -----------------------------------------------------------------------------
if __name__ == "__main__":
    # Small, divisible shapes consistent with the module.
    N, C, H, W = 4, 16, 8, 8
    inter_dim, num_classes = 32, 12
    splits = ((1, 1, 1), (2, 2, 1), (1, 2, 2))

    root = jax.random.PRNGKey(0)
    kx, kp = jax.random.split(root)
    x = jax.random.normal(kx, (N, C, H, W), jnp.float32)

    # Per split: s0*s1*s2 part BNNecks with in_dim // s0, plus one triplet
    # BNNeck with full in_dim (mirrors __init__).
    keys = iter(jax.random.split(kp, 64))
    part_params = []
    triplet_param_list = []
    for s in splits:
        triplet_param_list.append(
            init_bnneck_params(next(keys), C, inter_dim, num_classes))
        group = [init_bnneck_params(next(keys), C // s[0], inter_dim, num_classes)
                 for _ in range(s[0] * s[1] * s[2])]
        part_params.append(stack_params(group))
    triplet_params = stack_params(triplet_param_list)

    # Pack parameters once (per-group lane-dense widths, bf16 matmul operands).
    packed = prepare_packed_params(splits, part_params, triplet_params,
                                   C, inter_dim, num_classes)

    fwd = jax.jit(part_based_forward, static_argnums=(1, 3, 4))
    logits_pack, triplet_pack = fwd(x, splits, packed, inter_dim, num_classes)
    jax.block_until_ready([t for pair in logits_pack + triplet_pack for t in pair])

    # Verify against pure-JAX reference (bf16 output storage -> 3e-2 tol).
    ref_logits_pack, ref_triplet_pack = part_based_ref(x, splits, part_params,
                                                       triplet_params)
    for (a1, a2), (r1, r2) in zip(logits_pack + triplet_pack,
                                  ref_logits_pack + ref_triplet_pack):
        assert jnp.allclose(a1.astype(jnp.float32), r1, atol=3e-2, rtol=3e-2)
        assert jnp.allclose(a2.astype(jnp.float32), r2, atol=3e-2, rtol=3e-2)

    print("KERNEL_OK")
</pallas_src>

<mosaic_0001>
module attributes {stable_mosaic.version = 11 : i64} {
  func.func @bnneck_group_kernel(%arg0: i32, %arg1: i32, %arg2: memref<4x8x128xbf16, #tpu.memory_space<vmem>>, %arg3: memref<4x128x128xbf16, #tpu.memory_space<vmem>>, %arg4: memref<4x3x128xf32, #tpu.memory_space<vmem>>, %arg5: memref<4x128x128xbf16, #tpu.memory_space<vmem>>, %arg6: memref<4x8x128xbf16, #tpu.memory_space<vmem>>, %arg7: memref<4x8x128xbf16, #tpu.memory_space<vmem>>, %arg8: memref<4x8x128xbf16, #tpu.memory_space<vmem>>) attributes {dimension_semantics = [#tpu.dimension_semantics<parallel>, #tpu.dimension_semantics<arbitrary>], iteration_bounds = array<i64: 1, 1>, scalar_prefetch = 0 : i64, scratch_operands = 1 : i64, tpu.core_type = #tpu.core_type<tc>, window_params = [{transform_indices = @transform_0, window_bounds = array<i64: 4, 8, 128>}, {transform_indices = @transform_1, window_bounds = array<i64: 4, 128, 128>}, {transform_indices = @transform_2, window_bounds = array<i64: 4, 3, 128>}, {transform_indices = @transform_3, window_bounds = array<i64: 4, 128, 128>}, {transform_indices = @transform_4, window_bounds = array<i64: 4, 8, 128>}, {transform_indices = @transform_5, window_bounds = array<i64: 4, 8, 128>}]} {
    %c0_i32 = arith.constant 0 : i32
    %0 = arith.cmpi eq, %arg1, %c0_i32 : i32
    %1 = arith.extui %0 : i1 to i32
    %c0_i32_0 = arith.constant 0 : i32
    %2 = arith.cmpi ne, %1, %c0_i32_0 : i32
    scf.if %2 {
      %39 = tpu.iota {dimensions = array<i32: 0>} : vector<8x1xi32>
      %c4_i32 = arith.constant 4 : i32
      %40 = vector.broadcast %c4_i32 : i32 to vector<8x1xi32>
      %41 = arith.cmpi slt, %39, %40 : vector<8x1xi32>
      %42 = arith.extui %41 : vector<8x1xi1> to vector<8x1xi32>
      %43 = arith.sitofp %42 : vector<8x1xi32> to vector<8x1xf32>
      %c0_36 = arith.constant 0 : index
      %c0_37 = arith.constant 0 : index
      %c0_38 = arith.constant 0 : index
      %44 = vector.load %arg2[%c0_36, %c0_37, %c0_38] : memref<4x8x128xbf16, #tpu.memory_space<vmem>>, vector<1x8x128xbf16>
      %45 = vector.shape_cast %44 : vector<1x8x128xbf16> to vector<8x128xbf16>
      %c0_39 = arith.constant 0 : index
      %c0_40 = arith.constant 0 : index
      %c0_41 = arith.constant 0 : index
      %46 = vector.load %arg3[%c0_39, %c0_40, %c0_41] : memref<4x128x128xbf16, #tpu.memory_space<vmem>>, vector<1x128x128xbf16>
      %47 = vector.shape_cast %46 : vector<1x128x128xbf16> to vector<128x128xbf16>
      %cst_42 = arith.constant dense<0.000000e+00> : vector<8x128xf32>
      %48 = tpu.matmul %45, %47, %cst_42 {dimension_numbers = #tpu.dot_dimension_numbers<[1], [0], [0], [1], [0, 0, 1, 1], [], []>} : vector<8x128xbf16>, vector<128x128xbf16>, vector<8x128xf32> -> vector<8x128xf32>
      %c0_43 = arith.constant 0 : index
      %c0_44 = arith.constant 0 : index
      %c0_45 = arith.constant 0 : index
      %49 = vector.load %arg4[%c0_43, %c0_44, %c0_45] : memref<4x3x128xf32, #tpu.memory_space<vmem>>, vector<1x3x128xf32>
      %50 = vector.shape_cast %49 : vector<1x3x128xf32> to vector<3x128xf32>
      %51 = vector.extract_strided_slice %50 {offsets = [0, 0], sizes = [1, 128], strides = [1, 1]} : vector<3x128xf32> to vector<1x128xf32>
      %52 = vector.extract_strided_slice %50 {offsets = [1, 0], sizes = [1, 128], strides = [1, 1]} : vector<3x128xf32> to vector<1x128xf32>
      %53 = vector.extract_strided_slice %50 {offsets = [2, 0], sizes = [1, 128], strides = [1, 1]} : vector<3x128xf32> to vector<1x128xf32>
      %54 = vector.broadcast %43 : vector<8x1xf32> to vector<8x128xf32>
      %55 = arith.mulf %48, %54 : vector<8x128xf32>
      %cst_46 = arith.constant dense<0.000000e+00> : vector<128xf32>
      %56 = vector.multi_reduction <add>, %55, %cst_46 [0] : vector<8x128xf32> to vector<128xf32>
      %57 = vector.shape_cast %56 : vector<128xf32> to vector<1x128xf32>
      %cst_47 = arith.constant 2.500000e-01 : f32
      %58 = vector.broadcast %cst_47 : f32 to vector<1x128xf32>
      %59 = arith.mulf %57, %58 : vector<1x128xf32>
      %60 = vector.broadcast %59 : vector<1x128xf32> to vector<8x128xf32>
      %61 = arith.subf %48, %60 : vector<8x128xf32>
      %62 = vector.broadcast %43 : vector<8x1xf32> to vector<8x128xf32>
      %63 = arith.mulf %61, %62 : vector<8x128xf32>
      %64 = arith.mulf %63, %63 : vector<8x128xf32>
      %cst_48 = arith.constant dense<0.000000e+00> : vector<128xf32>
      %65 = vector.multi_reduction <add>, %64, %cst_48 [0] : vector<8x128xf32> to vector<128xf32>
      %66 = vector.shape_cast %65 : vector<128xf32> to vector<1x128xf32>
      %cst_49 = arith.constant 2.500000e-01 : f32
      %67 = vector.broadcast %cst_49 : f32 to vector<1x128xf32>
      %68 = arith.mulf %66, %67 : vector<1x128xf32>
      %cst_50 = arith.constant 9.99999974E-6 : f32
      %69 = vector.broadcast %cst_50 : f32 to vector<1x128xf32>
      %70 = arith.addf %68, %69 : vector<1x128xf32>
      %71 = math.rsqrt %70 : vector<1x128xf32>
      %72 = arith.mulf %52, %71 : vector<1x128xf32>
      %73 = arith.mulf %59, %72 : vector<1x128xf32>
      %74 = arith.subf %53, %73 : vector<1x128xf32>
      %75 = vector.broadcast %72 : vector<1x128xf32> to vector<8x128xf32>
      %76 = arith.mulf %48, %75 : vector<8x128xf32>
      %77 = vector.broadcast %74 : vector<1x128xf32> to vector<8x128xf32>
      %78 = arith.addf %76, %77 : vector<8x128xf32>
      %79 = arith.truncf %78 : vector<8x128xf32> to vector<8x128xbf16>
      %c0_51 = arith.constant 0 : index
      %c0_52 = arith.constant 0 : index
      %c0_53 = arith.constant 0 : index
      %80 = vector.load %arg8[%c0_51, %c0_52, %c0_53] : memref<4x8x128xbf16, #tpu.memory_space<vmem>>, vector<1x8x128xbf16>
      %81 = vector.shape_cast %80 : vector<1x8x128xbf16> to vector<8x128xbf16>
      %82 = vector.shape_cast %79 : vector<8x128xbf16> to vector<1x8x128xbf16>
      tpu.vector_store %arg8[%c0_51, %c0_52, %c0_53], %82 {strides = array<i32>} : memref<4x8x128xbf16, #tpu.memory_space<vmem>>, vector<1x8x128xbf16>,
      %83 = vector.broadcast %51 : vector<1x128xf32> to vector<8x128xf32>
      %84 = arith.addf %48, %83 : vector<8x128xf32>
      %85 = arith.truncf %84 : vector<8x128xf32> to vector<8x128xbf16>
      %c0_54 = arith.constant 0 : index
      %c0_55 = arith.constant 0 : index
      %c0_56 = arith.constant 0 : index
      %86 = vector.load %arg6[%c0_54, %c0_55, %c0_56] : memref<4x8x128xbf16, #tpu.memory_space<vmem>>, vector<1x8x128xbf16>
      %87 = vector.shape_cast %86 : vector<1x8x128xbf16> to vector<8x128xbf16>
      %88 = vector.shape_cast %85 : vector<8x128xbf16> to vector<1x8x128xbf16>
      tpu.vector_store %arg6[%c0_54, %c0_55, %c0_56], %88 {strides = array<i32>} : memref<4x8x128xbf16, #tpu.memory_space<vmem>>, vector<1x8x128xbf16>,
      %c1_57 = arith.constant 1 : index
      %c0_58 = arith.constant 0 : index
      %c0_59 = arith.constant 0 : index
      %89 = vector.load %arg2[%c1_57, %c0_58, %c0_59] : memref<4x8x128xbf16, #tpu.memory_space<vmem>>, vector<1x8x128xbf16>
      %90 = vector.shape_cast %89 : vector<1x8x128xbf16> to vector<8x128xbf16>
      %c1_60 = arith.constant 1 : index
      %c0_61 = arith.constant 0 : index
      %c0_62 = arith.constant 0 : index
      %91 = vector.load %arg3[%c1_60, %c0_61, %c0_62] : memref<4x128x128xbf16, #tpu.memory_space<vmem>>, vector<1x128x128xbf16>
      %92 = vector.shape_cast %91 : vector<1x128x128xbf16> to vector<128x128xbf16>
      %cst_63 = arith.constant dense<0.000000e+00> : vector<8x128xf32>
      %93 = tpu.matmul %90, %92, %cst_63 {dimension_numbers = #tpu.dot_dimension_numbers<[1], [0], [0], [1], [0, 0, 1, 1], [], []>} : vector<8x128xbf16>, vector<128x128xbf16>, vector<8x128xf32> -> vector<8x128xf32>
      %c1_64 = arith.constant 1 : index
      %c0_65 = arith.constant 0 : index
      %c0_66 = arith.constant 0 : index
      %94 = vector.load %arg4[%c1_64, %c0_65, %c0_66] : memref<4x3x128xf32, #tpu.memory_space<vmem>>, vector<1x3x128xf32>
      %95 = vector.shape_cast %94 : vector<1x3x128xf32> to vector<3x128xf32>
      %96 = vector.extract_strided_slice %95 {offsets = [0, 0], sizes = [1, 128], strides = [1, 1]} : vector<3x128xf32> to vector<1x128xf32>
      %97 = vector.extract_strided_slice %95 {offsets = [1, 0], sizes = [1, 128], strides = [1, 1]} : vector<3x128xf32> to vector<1x128xf32>
      %98 = vector.extract_strided_slice %95 {offsets = [2, 0], sizes = [1, 128], strides = [1, 1]} : vector<3x128xf32> to vector<1x128xf32>
      %99 = vector.broadcast %43 : vector<8x1xf32> to vector<8x128xf32>
      %100 = arith.mulf %93, %99 : vector<8x128xf32>
      %cst_67 = arith.constant dense<0.000000e+00> : vector<128xf32>
      %101 = vector.multi_reduction <add>, %100, %cst_67 [0] : vector<8x128xf32> to vector<128xf32>
      %102 = vector.shape_cast %101 : vector<128xf32> to vector<1x128xf32>
      %cst_68 = arith.constant 2.500000e-01 : f32
      %103 = vector.broadcast %cst_68 : f32 to vector<1x128xf32>
      %104 = arith.mulf %102, %103 : vector<1x128xf32>
      %105 = vector.broadcast %104 : vector<1x128xf32> to vector<8x128xf32>
      %106 = arith.subf %93, %105 : vector<8x128xf32>
      %107 = vector.broadcast %43 : vector<8x1xf32> to vector<8x128xf32>
      %108 = arith.mulf %106, %107 : vector<8x128xf32>
      %109 = arith.mulf %108, %108 : vector<8x128xf32>
      %cst_69 = arith.constant dense<0.000000e+00> : vector<128xf32>
      %110 = vector.multi_reduction <add>, %109, %cst_69 [0] : vector<8x128xf32> to vector<128xf32>
      %111 = vector.shape_cast %110 : vector<128xf32> to vector<1x128xf32>
      %cst_70 = arith.constant 2.500000e-01 : f32
      %112 = vector.broadcast %cst_70 : f32 to vector<1x128xf32>
      %113 = arith.mulf %111, %112 : vector<1x128xf32>
      %cst_71 = arith.constant 9.99999974E-6 : f32
      %114 = vector.broadcast %cst_71 : f32 to vector<1x128xf32>
      %115 = arith.addf %113, %114 : vector<1x128xf32>
      %116 = math.rsqrt %115 : vector<1x128xf32>
      %117 = arith.mulf %97, %116 : vector<1x128xf32>
      %118 = arith.mulf %104, %117 : vector<1x128xf32>
      %119 = arith.subf %98, %118 : vector<1x128xf32>
      %120 = vector.broadcast %117 : vector<1x128xf32> to vector<8x128xf32>
      %121 = arith.mulf %93, %120 : vector<8x128xf32>
      %122 = vector.broadcast %119 : vector<1x128xf32> to vector<8x128xf32>
      %123 = arith.addf %121, %122 : vector<8x128xf32>
      %124 = arith.truncf %123 : vector<8x128xf32> to vector<8x128xbf16>
      %c1_72 = arith.constant 1 : index
      %c0_73 = arith.constant 0 : index
      %c0_74 = arith.constant 0 : index
      %125 = vector.load %arg8[%c1_72, %c0_73, %c0_74] : memref<4x8x128xbf16, #tpu.memory_space<vmem>>, vector<1x8x128xbf16>
      %126 = vector.shape_cast %125 : vector<1x8x128xbf16> to vector<8x128xbf16>
      %127 = vector.shape_cast %124 : vector<8x128xbf16> to vector<1x8x128xbf16>
      tpu.vector_store %arg8[%c1_72, %c0_73, %c0_74], %127 {strides = array<i32>} : memref<4x8x128xbf16, #tpu.memory_space<vmem>>, vector<1x8x128xbf16>,
      %128 = vector.broadcast %96 : vector<1x128xf32> to vector<8x128xf32>
      %129 = arith.addf %93, %128 : vector<8x128xf32>
      %130 = arith.truncf %129 : vector<8x128xf32> to vector<8x128xbf16>
      %c1_75 = arith.constant 1 : index
      %c0_76 = arith.constant 0 : index
      %c0_77 = arith.constant 0 : index
      %131 = vector.load %arg6[%c1_75, %c0_76, %c0_77] : memref<4x8x128xbf16, #tpu.memory_space<vmem>>, vector<1x8x128xbf16>
      %132 = vector.shape_cast %131 : vector<1x8x128xbf16> to vector<8x128xbf16>
      %133 = vector.shape_cast %130 : vector<8x128xbf16> to vector<1x8x128xbf16>
      tpu.vector_store %arg6[%c1_75, %c0_76, %c0_77], %133 {strides = array<i32>} : memref<4x8x128xbf16, #tpu.memory_space<vmem>>, vector<1x8x128xbf16>,
      %c2_78 = arith.constant 2 : index
      %c0_79 = arith.constant 0 : index
      %c0_80 = arith.constant 0 : index
      %134 = vector.load %arg2[%c2_78, %c0_79, %c0_80] : memref<4x8x128xbf16, #tpu.memory_space<vmem>>, vector<1x8x128xbf16>
      %135 = vector.shape_cast %134 : vector<1x8x128xbf16> to vector<8x128xbf16>
      %c2_81 = arith.constant 2 : index
      %c0_82 = arith.constant 0 : index
      %c0_83 = arith.constant 0 : index
      %136 = vector.load %arg3[%c2_81, %c0_82, %c0_83] : memref<4x128x128xbf16, #tpu.memory_space<vmem>>, vector<1x128x128xbf16>
      %137 = vector.shape_cast %136 : vector<1x128x128xbf16> to vector<128x128xbf16>
      %cst_84 = arith.constant dense<0.000000e+00> : vector<8x128xf32>
      %138 = tpu.matmul %135, %137, %cst_84 {dimension_numbers = #tpu.dot_dimension_numbers<[1], [0], [0], [1], [0, 0, 1, 1], [], []>} : vector<8x128xbf16>, vector<128x128xbf16>, vector<8x128xf32> -> vector<8x128xf32>
      %c2_85 = arith.constant 2 : index
      %c0_86 = arith.constant 0 : index
      %c0_87 = arith.constant 0 : index
      %139 = vector.load %arg4[%c2_85, %c0_86, %c0_87] : memref<4x3x128xf32, #tpu.memory_space<vmem>>, vector<1x3x128xf32>
      %140 = vector.shape_cast %139 : vector<1x3x128xf32> to vector<3x128xf32>
      %141 = vector.extract_strided_slice %140 {offsets = [0, 0], sizes = [1, 128], strides = [1, 1]} : vector<3x128xf32> to vector<1x128xf32>
      %142 = vector.extract_strided_slice %140 {offsets = [1, 0], sizes = [1, 128], strides = [1, 1]} : vector<3x128xf32> to vector<1x128xf32>
      %143 = vector.extract_strided_slice %140 {offsets = [2, 0], sizes = [1, 128], strides = [1, 1]} : vector<3x128xf32> to vector<1x128xf32>
      %144 = vector.broadcast %43 : vector<8x1xf32> to vector<8x128xf32>
      %145 = arith.mulf %138, %144 : vector<8x128xf32>
      %cst_88 = arith.constant dense<0.000000e+00> : vector<128xf32>
      %146 = vector.multi_reduction <add>, %145, %cst_88 [0] : vector<8x128xf32> to vector<128xf32>
      %147 = vector.shape_cast %146 : vector<128xf32> to vector<1x128xf32>
      %cst_89 = arith.constant 2.500000e-01 : f32
      %148 = vector.broadcast %cst_89 : f32 to vector<1x128xf32>
      %149 = arith.mulf %147, %148 : vector<1x128xf32>
      %150 = vector.broadcast %149 : vector<1x128xf32> to vector<8x128xf32>
      %151 = arith.subf %138, %150 : vector<8x128xf32>
      %152 = vector.broadcast %43 : vector<8x1xf32> to vector<8x128xf32>
      %153 = arith.mulf %151, %152 : vector<8x128xf32>
      %154 = arith.mulf %153, %153 : vector<8x128xf32>
      %cst_90 = arith.constant dense<0.000000e+00> : vector<128xf32>
      %155 = vector.multi_reduction <add>, %154, %cst_90 [0] : vector<8x128xf32> to vector<128xf32>
      %156 = vector.shape_cast %155 : vector<128xf32> to vector<1x128xf32>
      %cst_91 = arith.constant 2.500000e-01 : f32
      %157 = vector.broadcast %cst_91 : f32 to vector<1x128xf32>
      %158 = arith.mulf %156, %157 : vector<1x128xf32>
      %cst_92 = arith.constant 9.99999974E-6 : f32
      %159 = vector.broadcast %cst_92 : f32 to vector<1x128xf32>
      %160 = arith.addf %158, %159 : vector<1x128xf32>
      %161 = math.rsqrt %160 : vector<1x128xf32>
      %162 = arith.mulf %142, %161 : vector<1x128xf32>
      %163 = arith.mulf %149, %162 : vector<1x128xf32>
      %164 = arith.subf %143, %163 : vector<1x128xf32>
      %165 = vector.broadcast %162 : vector<1x128xf32> to vector<8x128xf32>
      %166 = arith.mulf %138, %165 : vector<8x128xf32>
      %167 = vector.broadcast %164 : vector<1x128xf32> to vector<8x128xf32>
      %168 = arith.addf %166, %167 : vector<8x128xf32>
      %169 = arith.truncf %168 : vector<8x128xf32> to vector<8x128xbf16>
      %c2_93 = arith.constant 2 : index
      %c0_94 = arith.constant 0 : index
      %c0_95 = arith.constant 0 : index
      %170 = vector.load %arg8[%c2_93, %c0_94, %c0_95] : memref<4x8x128xbf16, #tpu.memory_space<vmem>>, vector<1x8x128xbf16>
      %171 = vector.shape_cast %170 : vector<1x8x128xbf16> to vector<8x128xbf16>
      %172 = vector.shape_cast %169 : vector<8x128xbf16> to vector<1x8x128xbf16>
      tpu.vector_store %arg8[%c2_93, %c0_94, %c0_95], %172 {strides = array<i32>} : memref<4x8x128xbf16, #tpu.memory_space<vmem>>, vector<1x8x128xbf16>,
      %173 = vector.broadcast %141 : vector<1x128xf32> to vector<8x128xf32>
      %174 = arith.addf %138, %173 : vector<8x128xf32>
      %175 = arith.truncf %174 : vector<8x128xf32> to vector<8x128xbf16>
      %c2_96 = arith.constant 2 : index
      %c0_97 = arith.constant 0 : index
      %c0_98 = arith.constant 0 : index
      %176 = vector.load %arg6[%c2_96, %c0_97, %c0_98] : memref<4x8x128xbf16, #tpu.memory_space<vmem>>, vector<1x8x128xbf16>
      %177 = vector.shape_cast %176 : vector<1x8x128xbf16> to vector<8x128xbf16>
      %178 = vector.shape_cast %175 : vector<8x128xbf16> to vector<1x8x128xbf16>
      tpu.vector_store %arg6[%c2_96, %c0_97, %c0_98], %178 {strides = array<i32>} : memref<4x8x128xbf16, #tpu.memory_space<vmem>>, vector<1x8x128xbf16>,
      %c3_99 = arith.constant 3 : index
      %c0_100 = arith.constant 0 : index
      %c0_101 = arith.constant 0 : index
      %179 = vector.load %arg2[%c3_99, %c0_100, %c0_101] : memref<4x8x128xbf16, #tpu.memory_space<vmem>>, vector<1x8x128xbf16>
      %180 = vector.shape_cast %179 : vector<1x8x128xbf16> to vector<8x128xbf16>
      %c3_102 = arith.constant 3 : index
      %c0_103 = arith.constant 0 : index
      %c0_104 = arith.constant 0 : index
      %181 = vector.load %arg3[%c3_102, %c0_103, %c0_104] : memref<4x128x128xbf16, #tpu.memory_space<vmem>>, vector<1x128x128xbf16>
      %182 = vector.shape_cast %181 : vector<1x128x128xbf16> to vector<128x128xbf16>
      %cst_105 = arith.constant dense<0.000000e+00> : vector<8x128xf32>
      %183 = tpu.matmul %180, %182, %cst_105 {dimension_numbers = #tpu.dot_dimension_numbers<[1], [0], [0], [1], [0, 0, 1, 1], [], []>} : vector<8x128xbf16>, vector<128x128xbf16>, vector<8x128xf32> -> vector<8x128xf32>
      %c3_106 = arith.constant 3 : index
      %c0_107 = arith.constant 0 : index
      %c0_108 = arith.constant 0 : index
      %184 = vector.load %arg4[%c3_106, %c0_107, %c0_108] : memref<4x3x128xf32, #tpu.memory_space<vmem>>, vector<1x3x128xf32>
      %185 = vector.shape_cast %184 : vector<1x3x128xf32> to vector<3x128xf32>
      %186 = vector.extract_strided_slice %185 {offsets = [0, 0], sizes = [1, 128], strides = [1, 1]} : vector<3x128xf32> to vector<1x128xf32>
      %187 = vector.extract_strided_slice %185 {offsets = [1, 0], sizes = [1, 128], strides = [1, 1]} : vector<3x128xf32> to vector<1x128xf32>
      %188 = vector.extract_strided_slice %185 {offsets = [2, 0], sizes = [1, 128], strides = [1, 1]} : vector<3x128xf32> to vector<1x128xf32>
      %189 = vector.broadcast %43 : vector<8x1xf32> to vector<8x128xf32>
      %190 = arith.mulf %183, %189 : vector<8x128xf32>
      %cst_109 = arith.constant dense<0.000000e+00> : vector<128xf32>
      %191 = vector.multi_reduction <add>, %190, %cst_109 [0] : vector<8x128xf32> to vector<128xf32>
      %192 = vector.shape_cast %191 : vector<128xf32> to vector<1x128xf32>
      %cst_110 = arith.constant 2.500000e-01 : f32
      %193 = vector.broadcast %cst_110 : f32 to vector<1x128xf32>
      %194 = arith.mulf %192, %193 : vector<1x128xf32>
      %195 = vector.broadcast %194 : vector<1x128xf32> to vector<8x128xf32>
      %196 = arith.subf %183, %195 : vector<8x128xf32>
      %197 = vector.broadcast %43 : vector<8x1xf32> to vector<8x128xf32>
      %198 = arith.mulf %196, %197 : vector<8x128xf32>
      %199 = arith.mulf %198, %198 : vector<8x128xf32>
      %cst_111 = arith.constant dense<0.000000e+00> : vector<128xf32>
      %200 = vector.multi_reduction <add>, %199, %cst_111 [0] : vector<8x128xf32> to vector<128xf32>
      %201 = vector.shape_cast %200 : vector<128xf32> to vector<1x128xf32>
      %cst_112 = arith.constant 2.500000e-01 : f32
      %202 = vector.broadcast %cst_112 : f32 to vector<1x128xf32>
      %203 = arith.mulf %201, %202 : vector<1x128xf32>
      %cst_113 = arith.constant 9.99999974E-6 : f32
      %204 = vector.broadcast %cst_113 : f32 to vector<1x128xf32>
      %205 = arith.addf %203, %204 : vector<1x128xf32>
      %206 = math.rsqrt %205 : vector<1x128xf32>
      %207 = arith.mulf %187, %206 : vector<1x128xf32>
      %208 = arith.mulf %194, %207 : vector<1x128xf32>
      %209 = arith.subf %188, %208 : vector<1x128xf32>
      %210 = vector.broadcast %207 : vector<1x128xf32> to vector<8x128xf32>
      %211 = arith.mulf %183, %210 : vector<8x128xf32>
      %212 = vector.broadcast %209 : vector<1x128xf32> to vector<8x128xf32>
      %213 = arith.addf %211, %212 : vector<8x128xf32>
      %214 = arith.truncf %213 : vector<8x128xf32> to vector<8x128xbf16>
      %c3_114 = arith.constant 3 : index
      %c0_115 = arith.constant 0 : index
      %c0_116 = arith.constant 0 : index
      %215 = vector.load %arg8[%c3_114, %c0_115, %c0_116] : memref<4x8x128xbf16, #tpu.memory_space<vmem>>, vector<1x8x128xbf16>
      %216 = vector.shape_cast %215 : vector<1x8x128xbf16> to vector<8x128xbf16>
      %217 = vector.shape_cast %214 : vector<8x128xbf16> to vector<1x8x128xbf16>
      tpu.vector_store %arg8[%c3_114, %c0_115, %c0_116], %217 {strides = array<i32>} : memref<4x8x128xbf16, #tpu.memory_space<vmem>>, vector<1x8x128xbf16>,
      %218 = vector.broadcast %186 : vector<1x128xf32> to vector<8x128xf32>
      %219 = arith.addf %183, %218 : vector<8x128xf32>
      %220 = arith.truncf %219 : vector<8x128xf32> to vector<8x128xbf16>
      %c3_117 = arith.constant 3 : index
      %c0_118 = arith.constant 0 : index
      %c0_119 = arith.constant 0 : index
      %221 = vector.load %arg6[%c3_117, %c0_118, %c0_119] : memref<4x8x128xbf16, #tpu.memory_space<vmem>>, vector<1x8x128xbf16>
      %222 = vector.shape_cast %221 : vector<1x8x128xbf16> to vector<8x128xbf16>
      %223 = vector.shape_cast %220 : vector<8x128xbf16> to vector<1x8x128xbf16>
      tpu.vector_store %arg6[%c3_117, %c0_118, %c0_119], %223 {strides = array<i32>} : memref<4x8x128xbf16, #tpu.memory_space<vmem>>, vector<1x8x128xbf16>,
    } else {
    }
    %c0 = arith.constant 0 : index
    %c0_1 = arith.constant 0 : index
    %c0_2 = arith.constant 0 : index
    %3 = vector.load %arg8[%c0, %c0_1, %c0_2] : memref<4x8x128xbf16, #tpu.memory_space<vmem>>, vector<1x8x128xbf16>
    %4 = vector.shape_cast %3 : vector<1x8x128xbf16> to vector<8x128xbf16>
    %c0_3 = arith.constant 0 : index
    %c0_4 = arith.constant 0 : index
    %c0_5 = arith.constant 0 : index
    %5 = vector.load %arg5[%c0_3, %c0_4, %c0_5] : memref<4x128x128xbf16, #tpu.memory_space<vmem>>, vector<1x128x128xbf16>
    %6 = vector.shape_cast %5 : vector<1x128x128xbf16> to vector<128x128xbf16>
    %cst = arith.constant dense<0.000000e+00> : vector<8x128xf32>
    %7 = tpu.matmul %4, %6, %cst {dimension_numbers = #tpu.dot_dimension_numbers<[1], [0], [0], [1], [0, 0, 1, 1], [], []>} : vector<8x128xbf16>, vector<128x128xbf16>, vector<8x128xf32> -> vector<8x128xf32>
    %8 = arith.truncf %7 : vector<8x128xf32> to vector<8x128xbf16>
    %c0_6 = arith.constant 0 : index
    %c0_7 = arith.constant 0 : index
    %c0_8 = arith.constant 0 : index
    %9 = vector.load %arg7[%c0_6, %c0_7, %c0_8] : memref<4x8x128xbf16, #tpu.memory_space<vmem>>, vector<1x8x128xbf16>
    %10 = vector.shape_cast %9 : vector<1x8x128xbf16> to vector<8x128xbf16>
    %11 = vector.shape_cast %8 : vector<8x128xbf16> to vector<1x8x128xbf16>
    tpu.vector_store %arg7[%c0_6, %c0_7, %c0_8], %11 {strides = array<i32>} : memref<4x8x128xbf16, #tpu.memory_space<vmem>>, vector<1x8x128xbf16>,
    %c1 = arith.constant 1 : index
    %c0_9 = arith.constant 0 : index
    %c0_10 = arith.constant 0 : index
    %12 = vector.load %arg8[%c1, %c0_9, %c0_10] : memref<4x8x128xbf16, #tpu.memory_space<vmem>>, vector<1x8x128xbf16>
    %13 = vector.shape_cast %12 : vector<1x8x128xbf16> to vector<8x128xbf16>
    %c1_11 = arith.constant 1 : index
    %c0_12 = arith.constant 0 : index
    %c0_13 = arith.constant 0 : index
    %14 = vector.load %arg5[%c1_11, %c0_12, %c0_13] : memref<4x128x128xbf16, #tpu.memory_space<vmem>>, vector<1x128x128xbf16>
    %15 = vector.shape_cast %14 : vector<1x128x128xbf16> to vector<128x128xbf16>
    %cst_14 = arith.constant dense<0.000000e+00> : vector<8x128xf32>
    %16 = tpu.matmul %13, %15, %cst_14 {dimension_numbers = #tpu.dot_dimension_numbers<[1], [0], [0], [1], [0, 0, 1, 1], [], []>} : vector<8x128xbf16>, vector<128x128xbf16>, vector<8x128xf32> -> vector<8x128xf32>
    %17 = arith.truncf %16 : vector<8x128xf32> to vector<8x128xbf16>
    %c1_15 = arith.constant 1 : index
    %c0_16 = arith.constant 0 : index
    %c0_17 = arith.constant 0 : index
    %18 = vector.load %arg7[%c1_15, %c0_16, %c0_17] : memref<4x8x128xbf16, #tpu.memory_space<vmem>>, vector<1x8x128xbf16>
    %19 = vector.shape_cast %18 : vector<1x8x128xbf16> to vector<8x128xbf16>
    %20 = vector.shape_cast %17 : vector<8x128xbf16> to vector<1x8x128xbf16>
    tpu.vector_store %arg7[%c1_15, %c0_16, %c0_17], %20 {strides = array<i32>} : memref<4x8x128xbf16, #tpu.memory_space<vmem>>, vector<1x8x128xbf16>,
    %c2 = arith.constant 2 : index
    %c0_18 = arith.constant 0 : index
    %c0_19 = arith.constant 0 : index
    %21 = vector.load %arg8[%c2, %c0_18, %c0_19] : memref<4x8x128xbf16, #tpu.memory_space<vmem>>, vector<1x8x128xbf16>
    %22 = vector.shape_cast %21 : vector<1x8x128xbf16> to vector<8x128xbf16>
    %c2_20 = arith.constant 2 : index
    %c0_21 = arith.constant 0 : index
    %c0_22 = arith.constant 0 : index
    %23 = vector.load %arg5[%c2_20, %c0_21, %c0_22] : memref<4x128x128xbf16, #tpu.memory_space<vmem>>, vector<1x128x128xbf16>
    %24 = vector.shape_cast %23 : vector<1x128x128xbf16> to vector<128x128xbf16>
    %cst_23 = arith.constant dense<0.000000e+00> : vector<8x128xf32>
    %25 = tpu.matmul %22, %24, %cst_23 {dimension_numbers = #tpu.dot_dimension_numbers<[1], [0], [0], [1], [0, 0, 1, 1], [], []>} : vector<8x128xbf16>, vector<128x128xbf16>, vector<8x128xf32> -> vector<8x128xf32>
    %26 = arith.truncf %25 : vector<8x128xf32> to vector<8x128xbf16>
    %c2_24 = arith.constant 2 : index
    %c0_25 = arith.constant 0 : index
    %c0_26 = arith.constant 0 : index
    %27 = vector.load %arg7[%c2_24, %c0_25, %c0_26] : memref<4x8x128xbf16, #tpu.memory_space<vmem>>, vector<1x8x128xbf16>
    %28 = vector.shape_cast %27 : vector<1x8x128xbf16> to vector<8x128xbf16>
    %29 = vector.shape_cast %26 : vector<8x128xbf16> to vector<1x8x128xbf16>
    tpu.vector_store %arg7[%c2_24, %c0_25, %c0_26], %29 {strides = array<i32>} : memref<4x8x128xbf16, #tpu.memory_space<vmem>>, vector<1x8x128xbf16>,
    %c3 = arith.constant 3 : index
    %c0_27 = arith.constant 0 : index
    %c0_28 = arith.constant 0 : index
    %30 = vector.load %arg8[%c3, %c0_27, %c0_28] : memref<4x8x128xbf16, #tpu.memory_space<vmem>>, vector<1x8x128xbf16>
    %31 = vector.shape_cast %30 : vector<1x8x128xbf16> to vector<8x128xbf16>
    %c3_29 = arith.constant 3 : index
    %c0_30 = arith.constant 0 : index
    %c0_31 = arith.constant 0 : index
    %32 = vector.load %arg5[%c3_29, %c0_30, %c0_31] : memref<4x128x128xbf16, #tpu.memory_space<vmem>>, vector<1x128x128xbf16>
    %33 = vector.shape_cast %32 : vector<1x128x128xbf16> to vector<128x128xbf16>
    %cst_32 = arith.constant dense<0.000000e+00> : vector<8x128xf32>
    %34 = tpu.matmul %31, %33, %cst_32 {dimension_numbers = #tpu.dot_dimension_numbers<[1], [0], [0], [1], [0, 0, 1, 1], [], []>} : vector<8x128xbf16>, vector<128x128xbf16>, vector<8x128xf32> -> vector<8x128xf32>
    %35 = arith.truncf %34 : vector<8x128xf32> to vector<8x128xbf16>
    %c3_33 = arith.constant 3 : index
    %c0_34 = arith.constant 0 : index
    %c0_35 = arith.constant 0 : index
    %36 = vector.load %arg7[%c3_33, %c0_34, %c0_35] : memref<4x8x128xbf16, #tpu.memory_space<vmem>>, vector<1x8x128xbf16>
    %37 = vector.shape_cast %36 : vector<1x8x128xbf16> to vector<8x128xbf16>
    %38 = vector.shape_cast %35 : vector<8x128xbf16> to vector<1x8x128xbf16>
    tpu.vector_store %arg7[%c3_33, %c0_34, %c0_35], %38 {strides = array<i32>} : memref<4x8x128xbf16, #tpu.memory_space<vmem>>, vector<1x8x128xbf16>,
    return
  }
  func.func @transform_0(%arg0: i32, %arg1: i32) -> (i32, i32, i32) {
    %c0_i32 = arith.constant 0 : i32
    %c0_i32_0 = arith.constant 0 : i32
    %c0_i32_1 = arith.constant 0 : i32
    return %arg0, %c0_i32, %c0_i32_0 : i32, i32, i32
  }
  func.func @transform_1(%arg0: i32, %arg1: i32) -> (i32, i32, i32) {
    %c0_i32 = arith.constant 0 : i32
    %c0_i32_0 = arith.constant 0 : i32
    %c0_i32_1 = arith.constant 0 : i32
    return %arg0, %c0_i32, %c0_i32_0 : i32, i32, i32
  }
  func.func @transform_2(%arg0: i32, %arg1: i32) -> (i32, i32, i32) {
    %c0_i32 = arith.constant 0 : i32
    %c0_i32_0 = arith.constant 0 : i32
    %c0_i32_1 = arith.constant 0 : i32
    return %arg0, %c0_i32, %c0_i32_0 : i32, i32, i32
  }
  func.func @transform_3(%arg0: i32, %arg1: i32) -> (i32, i32, i32) {
    %c0_i32 = arith.constant 0 : i32
    %c0_i32_0 = arith.constant 0 : i32
    return %arg0, %c0_i32, %arg1 : i32, i32, i32
  }
  func.func @transform_4(%arg0: i32, %arg1: i32) -> (i32, i32, i32) {
    %c0_i32 = arith.constant 0 : i32
    %c0_i32_0 = arith.constant 0 : i32
    %c0_i32_1 = arith.constant 0 : i32
    return %arg0, %c0_i32, %c0_i32_0 : i32, i32, i32
  }
  func.func @transform_5(%arg0: i32, %arg1: i32) -> (i32, i32, i32) {
    %c0_i32 = arith.constant 0 : i32
    %c0_i32_0 = arith.constant 0 : i32
    return %arg0, %c0_i32, %arg1 : i32, i32, i32
  }
}

module attributes {stable_mosaic.version = 11 : i64} {
  func.func @bnneck_group_kernel(%arg0: i32, %arg1: i32, %arg2: memref<1x8x128xbf16, #tpu.memory_space<vmem>>, %arg3: memref<3x128x128xbf16, #tpu.memory_space<vmem>>, %arg4: memref<3x3x128xf32, #tpu.memory_space<vmem>>, %arg5: memref<3x128x128xbf16, #tpu.memory_space<vmem>>, %arg6: memref<3x8x128xbf16, #tpu.memory_space<vmem>>, %arg7: memref<3x8x128xbf16, #tpu.memory_space<vmem>>, %arg8: memref<3x8x128xbf16, #tpu.memory_space<vmem>>) attributes {dimension_semantics = [#tpu.dimension_semantics<parallel>, #tpu.dimension_semantics<arbitrary>], iteration_bounds = array<i64: 1, 1>, scalar_prefetch = 0 : i64, scratch_operands = 1 : i64, tpu.core_type = #tpu.core_type<tc>, window_params = [{pipeline_mode = #tpu.pipeline_mode<synchronous>, transform_indices = @transform_0, window_bounds = array<i64: 1, 8, 128>}, {transform_indices = @transform_1, window_bounds = array<i64: 3, 128, 128>}, {transform_indices = @transform_2, window_bounds = array<i64: 3, 3, 128>}, {transform_indices = @transform_3, window_bounds = array<i64: 3, 128, 128>}, {transform_indices = @transform_4, window_bounds = array<i64: 3, 8, 128>}, {transform_indices = @transform_5, window_bounds = array<i64: 3, 8, 128>}]} {
    %c0_i32 = arith.constant 0 : i32
    %0 = arith.cmpi eq, %arg1, %c0_i32 : i32
    %1 = arith.extui %0 : i1 to i32
    %c0_i32_0 = arith.constant 0 : i32
    %2 = arith.cmpi ne, %1, %c0_i32_0 : i32
    scf.if %2 {
      %30 = tpu.iota {dimensions = array<i32: 0>} : vector<8x1xi32>
      %c4_i32 = arith.constant 4 : i32
      %31 = vector.broadcast %c4_i32 : i32 to vector<8x1xi32>
      %32 = arith.cmpi slt, %30, %31 : vector<8x1xi32>
      %33 = arith.extui %32 : vector<8x1xi1> to vector<8x1xi32>
      %34 = arith.sitofp %33 : vector<8x1xi32> to vector<8x1xf32>
      %c0_27 = arith.constant 0 : index
      %c0_28 = arith.constant 0 : index
      %c0_29 = arith.constant 0 : index
      %35 = vector.load %arg2[%c0_27, %c0_28, %c0_29] : memref<1x8x128xbf16, #tpu.memory_space<vmem>>, vector<1x8x128xbf16>
      %36 = vector.shape_cast %35 : vector<1x8x128xbf16> to vector<8x128xbf16>
      %c0_30 = arith.constant 0 : index
      %c0_31 = arith.constant 0 : index
      %c0_32 = arith.constant 0 : index
      %37 = vector.load %arg3[%c0_30, %c0_31, %c0_32] : memref<3x128x128xbf16, #tpu.memory_space<vmem>>, vector<1x128x128xbf16>
      %38 = vector.shape_cast %37 : vector<1x128x128xbf16> to vector<128x128xbf16>
      %cst_33 = arith.constant dense<0.000000e+00> : vector<8x128xf32>
      %39 = tpu.matmul %36, %38, %cst_33 {dimension_numbers = #tpu.dot_dimension_numbers<[1], [0], [0], [1], [0, 0, 1, 1], [], []>} : vector<8x128xbf16>, vector<128x128xbf16>, vector<8x128xf32> -> vector<8x128xf32>
      %c0_34 = arith.constant 0 : index
      %c0_35 = arith.constant 0 : index
      %c0_36 = arith.constant 0 : index
      %40 = vector.load %arg4[%c0_34, %c0_35, %c0_36] : memref<3x3x128xf32, #tpu.memory_space<vmem>>, vector<1x3x128xf32>
      %41 = vector.shape_cast %40 : vector<1x3x128xf32> to vector<3x128xf32>
      %42 = vector.extract_strided_slice %41 {offsets = [0, 0], sizes = [1, 128], strides = [1, 1]} : vector<3x128xf32> to vector<1x128xf32>
      %43 = vector.extract_strided_slice %41 {offsets = [1, 0], sizes = [1, 128], strides = [1, 1]} : vector<3x128xf32> to vector<1x128xf32>
      %44 = vector.extract_strided_slice %41 {offsets = [2, 0], sizes = [1, 128], strides = [1, 1]} : vector<3x128xf32> to vector<1x128xf32>
      %45 = vector.broadcast %34 : vector<8x1xf32> to vector<8x128xf32>
      %46 = arith.mulf %39, %45 : vector<8x128xf32>
      %cst_37 = arith.constant dense<0.000000e+00> : vector<128xf32>
      %47 = vector.multi_reduction <add>, %46, %cst_37 [0] : vector<8x128xf32> to vector<128xf32>
      %48 = vector.shape_cast %47 : vector<128xf32> to vector<1x128xf32>
      %cst_38 = arith.constant 2.500000e-01 : f32
      %49 = vector.broadcast %cst_38 : f32 to vector<1x128xf32>
      %50 = arith.mulf %48, %49 : vector<1x128xf32>
      %51 = vector.broadcast %50 : vector<1x128xf32> to vector<8x128xf32>
      %52 = arith.subf %39, %51 : vector<8x128xf32>
      %53 = vector.broadcast %34 : vector<8x1xf32> to vector<8x128xf32>
      %54 = arith.mulf %52, %53 : vector<8x128xf32>
      %55 = arith.mulf %54, %54 : vector<8x128xf32>
      %cst_39 = arith.constant dense<0.000000e+00> : vector<128xf32>
      %56 = vector.multi_reduction <add>, %55, %cst_39 [0] : vector<8x128xf32> to vector<128xf32>
      %57 = vector.shape_cast %56 : vector<128xf32> to vector<1x128xf32>
      %cst_40 = arith.constant 2.500000e-01 : f32
      %58 = vector.broadcast %cst_40 : f32 to vector<1x128xf32>
      %59 = arith.mulf %57, %58 : vector<1x128xf32>
      %cst_41 = arith.constant 9.99999974E-6 : f32
      %60 = vector.broadcast %cst_41 : f32 to vector<1x128xf32>
      %61 = arith.addf %59, %60 : vector<1x128xf32>
      %62 = math.rsqrt %61 : vector<1x128xf32>
      %63 = arith.mulf %43, %62 : vector<1x128xf32>
      %64 = arith.mulf %50, %63 : vector<1x128xf32>
      %65 = arith.subf %44, %64 : vector<1x128xf32>
      %66 = vector.broadcast %63 : vector<1x128xf32> to vector<8x128xf32>
      %67 = arith.mulf %39, %66 : vector<8x128xf32>
      %68 = vector.broadcast %65 : vector<1x128xf32> to vector<8x128xf32>
      %69 = arith.addf %67, %68 : vector<8x128xf32>
      %70 = arith.truncf %69 : vector<8x128xf32> to vector<8x128xbf16>
      %c0_42 = arith.constant 0 : index
      %c0_43 = arith.constant 0 : index
      %c0_44 = arith.constant 0 : index
      %71 = vector.load %arg8[%c0_42, %c0_43, %c0_44] : memref<3x8x128xbf16, #tpu.memory_space<vmem>>, vector<1x8x128xbf16>
      %72 = vector.shape_cast %71 : vector<1x8x128xbf16> to vector<8x128xbf16>
      %73 = vector.shape_cast %70 : vector<8x128xbf16> to vector<1x8x128xbf16>
      tpu.vector_store %arg8[%c0_42, %c0_43, %c0_44], %73 {strides = array<i32>} : memref<3x8x128xbf16, #tpu.memory_space<vmem>>, vector<1x8x128xbf16>,
      %74 = vector.broadcast %42 : vector<1x128xf32> to vector<8x128xf32>
      %75 = arith.addf %39, %74 : vector<8x128xf32>
      %76 = arith.truncf %75 : vector<8x128xf32> to vector<8x128xbf16>
      %c0_45 = arith.constant 0 : index
      %c0_46 = arith.constant 0 : index
      %c0_47 = arith.constant 0 : index
      %77 = vector.load %arg6[%c0_45, %c0_46, %c0_47] : memref<3x8x128xbf16, #tpu.memory_space<vmem>>, vector<1x8x128xbf16>
      %78 = vector.shape_cast %77 : vector<1x8x128xbf16> to vector<8x128xbf16>
      %79 = vector.shape_cast %76 : vector<8x128xbf16> to vector<1x8x128xbf16>
      tpu.vector_store %arg6[%c0_45, %c0_46, %c0_47], %79 {strides = array<i32>} : memref<3x8x128xbf16, #tpu.memory_space<vmem>>, vector<1x8x128xbf16>,
      %c1_48 = arith.constant 1 : index
      %c0_49 = arith.constant 0 : index
      %c0_50 = arith.constant 0 : index
      %80 = vector.load %arg3[%c1_48, %c0_49, %c0_50] : memref<3x128x128xbf16, #tpu.memory_space<vmem>>, vector<1x128x128xbf16>
      %81 = vector.shape_cast %80 : vector<1x128x128xbf16> to vector<128x128xbf16>
      %cst_51 = arith.constant dense<0.000000e+00> : vector<8x128xf32>
      %82 = tpu.matmul %36, %81, %cst_51 {dimension_numbers = #tpu.dot_dimension_numbers<[1], [0], [0], [1], [0, 0, 1, 1], [], []>} : vector<8x128xbf16>, vector<128x128xbf16>, vector<8x128xf32> -> vector<8x128xf32>
      %c1_52 = arith.constant 1 : index
      %c0_53 = arith.constant 0 : index
      %c0_54 = arith.constant 0 : index
      %83 = vector.load %arg4[%c1_52, %c0_53, %c0_54] : memref<3x3x128xf32, #tpu.memory_space<vmem>>, vector<1x3x128xf32>
      %84 = vector.shape_cast %83 : vector<1x3x128xf32> to vector<3x128xf32>
      %85 = vector.extract_strided_slice %84 {offsets = [0, 0], sizes = [1, 128], strides = [1, 1]} : vector<3x128xf32> to vector<1x128xf32>
      %86 = vector.extract_strided_slice %84 {offsets = [1, 0], sizes = [1, 128], strides = [1, 1]} : vector<3x128xf32> to vector<1x128xf32>
      %87 = vector.extract_strided_slice %84 {offsets = [2, 0], sizes = [1, 128], strides = [1, 1]} : vector<3x128xf32> to vector<1x128xf32>
      %88 = vector.broadcast %34 : vector<8x1xf32> to vector<8x128xf32>
      %89 = arith.mulf %82, %88 : vector<8x128xf32>
      %cst_55 = arith.constant dense<0.000000e+00> : vector<128xf32>
      %90 = vector.multi_reduction <add>, %89, %cst_55 [0] : vector<8x128xf32> to vector<128xf32>
      %91 = vector.shape_cast %90 : vector<128xf32> to vector<1x128xf32>
      %cst_56 = arith.constant 2.500000e-01 : f32
      %92 = vector.broadcast %cst_56 : f32 to vector<1x128xf32>
      %93 = arith.mulf %91, %92 : vector<1x128xf32>
      %94 = vector.broadcast %93 : vector<1x128xf32> to vector<8x128xf32>
      %95 = arith.subf %82, %94 : vector<8x128xf32>
      %96 = vector.broadcast %34 : vector<8x1xf32> to vector<8x128xf32>
      %97 = arith.mulf %95, %96 : vector<8x128xf32>
      %98 = arith.mulf %97, %97 : vector<8x128xf32>
      %cst_57 = arith.constant dense<0.000000e+00> : vector<128xf32>
      %99 = vector.multi_reduction <add>, %98, %cst_57 [0] : vector<8x128xf32> to vector<128xf32>
      %100 = vector.shape_cast %99 : vector<128xf32> to vector<1x128xf32>
      %cst_58 = arith.constant 2.500000e-01 : f32
      %101 = vector.broadcast %cst_58 : f32 to vector<1x128xf32>
      %102 = arith.mulf %100, %101 : vector<1x128xf32>
      %cst_59 = arith.constant 9.99999974E-6 : f32
      %103 = vector.broadcast %cst_59 : f32 to vector<1x128xf32>
      %104 = arith.addf %102, %103 : vector<1x128xf32>
      %105 = math.rsqrt %104 : vector<1x128xf32>
      %106 = arith.mulf %86, %105 : vector<1x128xf32>
      %107 = arith.mulf %93, %106 : vector<1x128xf32>
      %108 = arith.subf %87, %107 : vector<1x128xf32>
      %109 = vector.broadcast %106 : vector<1x128xf32> to vector<8x128xf32>
      %110 = arith.mulf %82, %109 : vector<8x128xf32>
      %111 = vector.broadcast %108 : vector<1x128xf32> to vector<8x128xf32>
      %112 = arith.addf %110, %111 : vector<8x128xf32>
      %113 = arith.truncf %112 : vector<8x128xf32> to vector<8x128xbf16>
      %c1_60 = arith.constant 1 : index
      %c0_61 = arith.constant 0 : index
      %c0_62 = arith.constant 0 : index
      %114 = vector.load %arg8[%c1_60, %c0_61, %c0_62] : memref<3x8x128xbf16, #tpu.memory_space<vmem>>, vector<1x8x128xbf16>
      %115 = vector.shape_cast %114 : vector<1x8x128xbf16> to vector<8x128xbf16>
      %116 = vector.shape_cast %113 : vector<8x128xbf16> to vector<1x8x128xbf16>
      tpu.vector_store %arg8[%c1_60, %c0_61, %c0_62], %116 {strides = array<i32>} : memref<3x8x128xbf16, #tpu.memory_space<vmem>>, vector<1x8x128xbf16>,
      %117 = vector.broadcast %85 : vector<1x128xf32> to vector<8x128xf32>
      %118 = arith.addf %82, %117 : vector<8x128xf32>
      %119 = arith.truncf %118 : vector<8x128xf32> to vector<8x128xbf16>
      %c1_63 = arith.constant 1 : index
      %c0_64 = arith.constant 0 : index
      %c0_65 = arith.constant 0 : index
      %120 = vector.load %arg6[%c1_63, %c0_64, %c0_65] : memref<3x8x128xbf16, #tpu.memory_space<vmem>>, vector<1x8x128xbf16>
      %121 = vector.shape_cast %120 : vector<1x8x128xbf16> to vector<8x128xbf16>
      %122 = vector.shape_cast %119 : vector<8x128xbf16> to vector<1x8x128xbf16>
      tpu.vector_store %arg6[%c1_63, %c0_64, %c0_65], %122 {strides = array<i32>} : memref<3x8x128xbf16, #tpu.memory_space<vmem>>, vector<1x8x128xbf16>,
      %c2_66 = arith.constant 2 : index
      %c0_67 = arith.constant 0 : index
      %c0_68 = arith.constant 0 : index
      %123 = vector.load %arg3[%c2_66, %c0_67, %c0_68] : memref<3x128x128xbf16, #tpu.memory_space<vmem>>, vector<1x128x128xbf16>
      %124 = vector.shape_cast %123 : vector<1x128x128xbf16> to vector<128x128xbf16>
      %cst_69 = arith.constant dense<0.000000e+00> : vector<8x128xf32>
      %125 = tpu.matmul %36, %124, %cst_69 {dimension_numbers = #tpu.dot_dimension_numbers<[1], [0], [0], [1], [0, 0, 1, 1], [], []>} : vector<8x128xbf16>, vector<128x128xbf16>, vector<8x128xf32> -> vector<8x128xf32>
      %c2_70 = arith.constant 2 : index
      %c0_71 = arith.constant 0 : index
      %c0_72 = arith.constant 0 : index
      %126 = vector.load %arg4[%c2_70, %c0_71, %c0_72] : memref<3x3x128xf32, #tpu.memory_space<vmem>>, vector<1x3x128xf32>
      %127 = vector.shape_cast %126 : vector<1x3x128xf32> to vector<3x128xf32>
      %128 = vector.extract_strided_slice %127 {offsets = [0, 0], sizes = [1, 128], strides = [1, 1]} : vector<3x128xf32> to vector<1x128xf32>
      %129 = vector.extract_strided_slice %127 {offsets = [1, 0], sizes = [1, 128], strides = [1, 1]} : vector<3x128xf32> to vector<1x128xf32>
      %130 = vector.extract_strided_slice %127 {offsets = [2, 0], sizes = [1, 128], strides = [1, 1]} : vector<3x128xf32> to vector<1x128xf32>
      %131 = vector.broadcast %34 : vector<8x1xf32> to vector<8x128xf32>
      %132 = arith.mulf %125, %131 : vector<8x128xf32>
      %cst_73 = arith.constant dense<0.000000e+00> : vector<128xf32>
      %133 = vector.multi_reduction <add>, %132, %cst_73 [0] : vector<8x128xf32> to vector<128xf32>
      %134 = vector.shape_cast %133 : vector<128xf32> to vector<1x128xf32>
      %cst_74 = arith.constant 2.500000e-01 : f32
      %135 = vector.broadcast %cst_74 : f32 to vector<1x128xf32>
      %136 = arith.mulf %134, %135 : vector<1x128xf32>
      %137 = vector.broadcast %136 : vector<1x128xf32> to vector<8x128xf32>
      %138 = arith.subf %125, %137 : vector<8x128xf32>
      %139 = vector.broadcast %34 : vector<8x1xf32> to vector<8x128xf32>
      %140 = arith.mulf %138, %139 : vector<8x128xf32>
      %141 = arith.mulf %140, %140 : vector<8x128xf32>
      %cst_75 = arith.constant dense<0.000000e+00> : vector<128xf32>
      %142 = vector.multi_reduction <add>, %141, %cst_75 [0] : vector<8x128xf32> to vector<128xf32>
      %143 = vector.shape_cast %142 : vector<128xf32> to vector<1x128xf32>
      %cst_76 = arith.constant 2.500000e-01 : f32
      %144 = vector.broadcast %cst_76 : f32 to vector<1x128xf32>
      %145 = arith.mulf %143, %144 : vector<1x128xf32>
      %cst_77 = arith.constant 9.99999974E-6 : f32
      %146 = vector.broadcast %cst_77 : f32 to vector<1x128xf32>
      %147 = arith.addf %145, %146 : vector<1x128xf32>
      %148 = math.rsqrt %147 : vector<1x128xf32>
      %149 = arith.mulf %129, %148 : vector<1x128xf32>
      %150 = arith.mulf %136, %149 : vector<1x128xf32>
      %151 = arith.subf %130, %150 : vector<1x128xf32>
      %152 = vector.broadcast %149 : vector<1x128xf32> to vector<8x128xf32>
      %153 = arith.mulf %125, %152 : vector<8x128xf32>
      %154 = vector.broadcast %151 : vector<1x128xf32> to vector<8x128xf32>
      %155 = arith.addf %153, %154 : vector<8x128xf32>
      %156 = arith.truncf %155 : vector<8x128xf32> to vector<8x128xbf16>
      %c2_78 = arith.constant 2 : index
      %c0_79 = arith.constant 0 : index
      %c0_80 = arith.constant 0 : index
      %157 = vector.load %arg8[%c2_78, %c0_79, %c0_80] : memref<3x8x128xbf16, #tpu.memory_space<vmem>>, vector<1x8x128xbf16>
      %158 = vector.shape_cast %157 : vector<1x8x128xbf16> to vector<8x128xbf16>
      %159 = vector.shape_cast %156 : vector<8x128xbf16> to vector<1x8x128xbf16>
      tpu.vector_store %arg8[%c2_78, %c0_79, %c0_80], %159 {strides = array<i32>} : memref<3x8x128xbf16, #tpu.memory_space<vmem>>, vector<1x8x128xbf16>,
      %160 = vector.broadcast %128 : vector<1x128xf32> to vector<8x128xf32>
      %161 = arith.addf %125, %160 : vector<8x128xf32>
      %162 = arith.truncf %161 : vector<8x128xf32> to vector<8x128xbf16>
      %c2_81 = arith.constant 2 : index
      %c0_82 = arith.constant 0 : index
      %c0_83 = arith.constant 0 : index
      %163 = vector.load %arg6[%c2_81, %c0_82, %c0_83] : memref<3x8x128xbf16, #tpu.memory_space<vmem>>, vector<1x8x128xbf16>
      %164 = vector.shape_cast %163 : vector<1x8x128xbf16> to vector<8x128xbf16>
      %165 = vector.shape_cast %162 : vector<8x128xbf16> to vector<1x8x128xbf16>
      tpu.vector_store %arg6[%c2_81, %c0_82, %c0_83], %165 {strides = array<i32>} : memref<3x8x128xbf16, #tpu.memory_space<vmem>>, vector<1x8x128xbf16>,
    } else {
    }
    %c0 = arith.constant 0 : index
    %c0_1 = arith.constant 0 : index
    %c0_2 = arith.constant 0 : index
    %3 = vector.load %arg8[%c0, %c0_1, %c0_2] : memref<3x8x128xbf16, #tpu.memory_space<vmem>>, vector<1x8x128xbf16>
    %4 = vector.shape_cast %3 : vector<1x8x128xbf16> to vector<8x128xbf16>
    %c0_3 = arith.constant 0 : index
    %c0_4 = arith.constant 0 : index
    %c0_5 = arith.constant 0 : index
    %5 = vector.load %arg5[%c0_3, %c0_4, %c0_5] : memref<3x128x128xbf16, #tpu.memory_space<vmem>>, vector<1x128x128xbf16>
    %6 = vector.shape_cast %5 : vector<1x128x128xbf16> to vector<128x128xbf16>
    %cst = arith.constant dense<0.000000e+00> : vector<8x128xf32>
    %7 = tpu.matmul %4, %6, %cst {dimension_numbers = #tpu.dot_dimension_numbers<[1], [0], [0], [1], [0, 0, 1, 1], [], []>} : vector<8x128xbf16>, vector<128x128xbf16>, vector<8x128xf32> -> vector<8x128xf32>
    %8 = arith.truncf %7 : vector<8x128xf32> to vector<8x128xbf16>
    %c0_6 = arith.constant 0 : index
    %c0_7 = arith.constant 0 : index
    %c0_8 = arith.constant 0 : index
    %9 = vector.load %arg7[%c0_6, %c0_7, %c0_8] : memref<3x8x128xbf16, #tpu.memory_space<vmem>>, vector<1x8x128xbf16>
    %10 = vector.shape_cast %9 : vector<1x8x128xbf16> to vector<8x128xbf16>
    %11 = vector.shape_cast %8 : vector<8x128xbf16> to vector<1x8x128xbf16>
    tpu.vector_store %arg7[%c0_6, %c0_7, %c0_8], %11 {strides = array<i32>} : memref<3x8x128xbf16, #tpu.memory_space<vmem>>, vector<1x8x128xbf16>,
    %c1 = arith.constant 1 : index
    %c0_9 = arith.constant 0 : index
    %c0_10 = arith.constant 0 : index
    %12 = vector.load %arg8[%c1, %c0_9, %c0_10] : memref<3x8x128xbf16, #tpu.memory_space<vmem>>, vector<1x8x128xbf16>
    %13 = vector.shape_cast %12 : vector<1x8x128xbf16> to vector<8x128xbf16>
    %c1_11 = arith.constant 1 : index
    %c0_12 = arith.constant 0 : index
    %c0_13 = arith.constant 0 : index
    %14 = vector.load %arg5[%c1_11, %c0_12, %c0_13] : memref<3x128x128xbf16, #tpu.memory_space<vmem>>, vector<1x128x128xbf16>
    %15 = vector.shape_cast %14 : vector<1x128x128xbf16> to vector<128x128xbf16>
    %cst_14 = arith.constant dense<0.000000e+00> : vector<8x128xf32>
    %16 = tpu.matmul %13, %15, %cst_14 {dimension_numbers = #tpu.dot_dimension_numbers<[1], [0], [0], [1], [0, 0, 1, 1], [], []>} : vector<8x128xbf16>, vector<128x128xbf16>, vector<8x128xf32> -> vector<8x128xf32>
    %17 = arith.truncf %16 : vector<8x128xf32> to vector<8x128xbf16>
    %c1_15 = arith.constant 1 : index
    %c0_16 = arith.constant 0 : index
    %c0_17 = arith.constant 0 : index
    %18 = vector.load %arg7[%c1_15, %c0_16, %c0_17] : memref<3x8x128xbf16, #tpu.memory_space<vmem>>, vector<1x8x128xbf16>
    %19 = vector.shape_cast %18 : vector<1x8x128xbf16> to vector<8x128xbf16>
    %20 = vector.shape_cast %17 : vector<8x128xbf16> to vector<1x8x128xbf16>
    tpu.vector_store %arg7[%c1_15, %c0_16, %c0_17], %20 {strides = array<i32>} : memref<3x8x128xbf16, #tpu.memory_space<vmem>>, vector<1x8x128xbf16>,
    %c2 = arith.constant 2 : index
    %c0_18 = arith.constant 0 : index
    %c0_19 = arith.constant 0 : index
    %21 = vector.load %arg8[%c2, %c0_18, %c0_19] : memref<3x8x128xbf16, #tpu.memory_space<vmem>>, vector<1x8x128xbf16>
    %22 = vector.shape_cast %21 : vector<1x8x128xbf16> to vector<8x128xbf16>
    %c2_20 = arith.constant 2 : index
    %c0_21 = arith.constant 0 : index
    %c0_22 = arith.constant 0 : index
    %23 = vector.load %arg5[%c2_20, %c0_21, %c0_22] : memref<3x128x128xbf16, #tpu.memory_space<vmem>>, vector<1x128x128xbf16>
    %24 = vector.shape_cast %23 : vector<1x128x128xbf16> to vector<128x128xbf16>
    %cst_23 = arith.constant dense<0.000000e+00> : vector<8x128xf32>
    %25 = tpu.matmul %22, %24, %cst_23 {dimension_numbers = #tpu.dot_dimension_numbers<[1], [0], [0], [1], [0, 0, 1, 1], [], []>} : vector<8x128xbf16>, vector<128x128xbf16>, vector<8x128xf32> -> vector<8x128xf32>
    %26 = arith.truncf %25 : vector<8x128xf32> to vector<8x128xbf16>
    %c2_24 = arith.constant 2 : index
    %c0_25 = arith.constant 0 : index
    %c0_26 = arith.constant 0 : index
    %27 = vector.load %arg7[%c2_24, %c0_25, %c0_26] : memref<3x8x128xbf16, #tpu.memory_space<vmem>>, vector<1x8x128xbf16>
    %28 = vector.shape_cast %27 : vector<1x8x128xbf16> to vector<8x128xbf16>
    %29 = vector.shape_cast %26 : vector<8x128xbf16> to vector<1x8x128xbf16>
    tpu.vector_store %arg7[%c2_24, %c0_25, %c0_26], %29 {strides = array<i32>} : memref<3x8x128xbf16, #tpu.memory_space<vmem>>, vector<1x8x128xbf16>,
    return
  }
  func.func @transform_0(%arg0: i32, %arg1: i32) -> (i32, i32, i32) {
    %c0_i32 = arith.constant 0 : i32
    %c0_i32_0 = arith.constant 0 : i32
    %c0_i32_1 = arith.constant 0 : i32
    %c0_i32_2 = arith.constant 0 : i32
    return %c0_i32, %c0_i32_0, %c0_i32_1 : i32, i32, i32
  }
  func.func @transform_1(%arg0: i32, %arg1: i32) -> (i32, i32, i32) {
    %c0_i32 = arith.constant 0 : i32
    %c0_i32_0 = arith.constant 0 : i32
    %c0_i32_1 = arith.constant 0 : i32
    return %arg0, %c0_i32, %c0_i32_0 : i32, i32, i32
  }
  func.func @transform_2(%arg0: i32, %arg1: i32) -> (i32, i32, i32) {
    %c0_i32 = arith.constant 0 : i32
    %c0_i32_0 = arith.constant 0 : i32
    %c0_i32_1 = arith.constant 0 : i32
    return %arg0, %c0_i32, %c0_i32_0 : i32, i32, i32
  }
  func.func @transform_3(%arg0: i32, %arg1: i32) -> (i32, i32, i32) {
    %c0_i32 = arith.constant 0 : i32
    %c0_i32_0 = arith.constant 0 : i32
    return %arg0, %c0_i32, %arg1 : i32, i32, i32
  }
  func.func @transform_4(%arg0: i32, %arg1: i32) -> (i32, i32, i32) {
    %c0_i32 = arith.constant 0 : i32
    %c0_i32_0 = arith.constant 0 : i32
    %c0_i32_1 = arith.constant 0 : i32
    return %arg0, %c0_i32, %c0_i32_0 : i32, i32, i32
  }
  func.func @transform_5(%arg0: i32, %arg1: i32) -> (i32, i32, i32) {
    %c0_i32 = arith.constant 0 : i32
    %c0_i32_0 = arith.constant 0 : i32
    return %arg0, %c0_i32, %arg1 : i32, i32, i32
  }
}

module attributes {stable_mosaic.version = 11 : i64} {
  func.func @bnneck_group_kernel(%arg0: i32, %arg1: i32, %arg2: memref<1x8x128xbf16, #tpu.memory_space<vmem>>, %arg3: memref<1x128x128xbf16, #tpu.memory_space<vmem>>, %arg4: memref<1x3x128xf32, #tpu.memory_space<vmem>>, %arg5: memref<1x128x128xbf16, #tpu.memory_space<vmem>>, %arg6: memref<1x8x128xbf16, #tpu.memory_space<vmem>>, %arg7: memref<1x8x128xbf16, #tpu.memory_space<vmem>>, %arg8: memref<1x8x128xbf16, #tpu.memory_space<vmem>>) attributes {dimension_semantics = [#tpu.dimension_semantics<parallel>, #tpu.dimension_semantics<arbitrary>], iteration_bounds = array<i64: 5, 1>, scalar_prefetch = 0 : i64, scratch_operands = 1 : i64, tpu.core_type = #tpu.core_type<tc>, window_params = [{transform_indices = @transform_0, window_bounds = array<i64: 1, 8, 128>}, {transform_indices = @transform_1, window_bounds = array<i64: 1, 128, 128>}, {transform_indices = @transform_2, window_bounds = array<i64: 1, 3, 128>}, {transform_indices = @transform_3, window_bounds = array<i64: 1, 128, 128>}, {transform_indices = @transform_4, window_bounds = array<i64: 1, 8, 128>}, {transform_indices = @transform_5, window_bounds = array<i64: 1, 8, 128>}]} {
    %c0_i32 = arith.constant 0 : i32
    %0 = arith.cmpi eq, %arg1, %c0_i32 : i32
    %1 = arith.extui %0 : i1 to i32
    %c0_i32_0 = arith.constant 0 : i32
    %2 = arith.cmpi ne, %1, %c0_i32_0 : i32
    scf.if %2 {
      %12 = tpu.iota {dimensions = array<i32: 0>} : vector<8x1xi32>
      %c4_i32 = arith.constant 4 : i32
      %13 = vector.broadcast %c4_i32 : i32 to vector<8x1xi32>
      %14 = arith.cmpi slt, %12, %13 : vector<8x1xi32>
      %15 = arith.extui %14 : vector<8x1xi1> to vector<8x1xi32>
      %16 = arith.sitofp %15 : vector<8x1xi32> to vector<8x1xf32>
      %c0_9 = arith.constant 0 : index
      %c0_10 = arith.constant 0 : index
      %c0_11 = arith.constant 0 : index
      %17 = vector.load %arg2[%c0_9, %c0_10, %c0_11] : memref<1x8x128xbf16, #tpu.memory_space<vmem>>, vector<1x8x128xbf16>
      %18 = vector.shape_cast %17 : vector<1x8x128xbf16> to vector<8x128xbf16>
      %c0_12 = arith.constant 0 : index
      %c0_13 = arith.constant 0 : index
      %c0_14 = arith.constant 0 : index
      %19 = vector.load %arg3[%c0_12, %c0_13, %c0_14] : memref<1x128x128xbf16, #tpu.memory_space<vmem>>, vector<1x128x128xbf16>
      %20 = vector.shape_cast %19 : vector<1x128x128xbf16> to vector<128x128xbf16>
      %cst_15 = arith.constant dense<0.000000e+00> : vector<8x128xf32>
      %21 = tpu.matmul %18, %20, %cst_15 {dimension_numbers = #tpu.dot_dimension_numbers<[1], [0], [0], [1], [0, 0, 1, 1], [], []>} : vector<8x128xbf16>, vector<128x128xbf16>, vector<8x128xf32> -> vector<8x128xf32>
      %c0_16 = arith.constant 0 : index
      %c0_17 = arith.constant 0 : index
      %c0_18 = arith.constant 0 : index
      %22 = vector.load %arg4[%c0_16, %c0_17, %c0_18] : memref<1x3x128xf32, #tpu.memory_space<vmem>>, vector<1x3x128xf32>
      %23 = vector.shape_cast %22 : vector<1x3x128xf32> to vector<3x128xf32>
      %24 = vector.extract_strided_slice %23 {offsets = [0, 0], sizes = [1, 128], strides = [1, 1]} : vector<3x128xf32> to vector<1x128xf32>
      %25 = vector.extract_strided_slice %23 {offsets = [1, 0], sizes = [1, 128], strides = [1, 1]} : vector<3x128xf32> to vector<1x128xf32>
      %26 = vector.extract_strided_slice %23 {offsets = [2, 0], sizes = [1, 128], strides = [1, 1]} : vector<3x128xf32> to vector<1x128xf32>
      %27 = vector.broadcast %16 : vector<8x1xf32> to vector<8x128xf32>
      %28 = arith.mulf %21, %27 : vector<8x128xf32>
      %cst_19 = arith.constant dense<0.000000e+00> : vector<128xf32>
      %29 = vector.multi_reduction <add>, %28, %cst_19 [0] : vector<8x128xf32> to vector<128xf32>
      %30 = vector.shape_cast %29 : vector<128xf32> to vector<1x128xf32>
      %cst_20 = arith.constant 2.500000e-01 : f32
      %31 = vector.broadcast %cst_20 : f32 to vector<1x128xf32>
      %32 = arith.mulf %30, %31 : vector<1x128xf32>
      %33 = vector.broadcast %32 : vector<1x128xf32> to vector<8x128xf32>
      %34 = arith.subf %21, %33 : vector<8x128xf32>
      %35 = vector.broadcast %16 : vector<8x1xf32> to vector<8x128xf32>
      %36 = arith.mulf %34, %35 : vector<8x128xf32>
      %37 = arith.mulf %36, %36 : vector<8x128xf32>
      %cst_21 = arith.constant dense<0.000000e+00> : vector<128xf32>
      %38 = vector.multi_reduction <add>, %37, %cst_21 [0] : vector<8x128xf32> to vector<128xf32>
      %39 = vector.shape_cast %38 : vector<128xf32> to vector<1x128xf32>
      %cst_22 = arith.constant 2.500000e-01 : f32
      %40 = vector.broadcast %cst_22 : f32 to vector<1x128xf32>
      %41 = arith.mulf %39, %40 : vector<1x128xf32>
      %cst_23 = arith.constant 9.99999974E-6 : f32
      %42 = vector.broadcast %cst_23 : f32 to vector<1x128xf32>
      %43 = arith.addf %41, %42 : vector<1x128xf32>
      %44 = math.rsqrt %43 : vector<1x128xf32>
      %45 = arith.mulf %25, %44 : vector<1x128xf32>
      %46 = arith.mulf %32, %45 : vector<1x128xf32>
      %47 = arith.subf %26, %46 : vector<1x128xf32>
      %48 = vector.broadcast %45 : vector<1x128xf32> to vector<8x128xf32>
      %49 = arith.mulf %21, %48 : vector<8x128xf32>
      %50 = vector.broadcast %47 : vector<1x128xf32> to vector<8x128xf32>
      %51 = arith.addf %49, %50 : vector<8x128xf32>
      %52 = arith.truncf %51 : vector<8x128xf32> to vector<8x128xbf16>
      %c0_24 = arith.constant 0 : index
      %c0_25 = arith.constant 0 : index
      %c0_26 = arith.constant 0 : index
      %53 = vector.load %arg8[%c0_24, %c0_25, %c0_26] : memref<1x8x128xbf16, #tpu.memory_space<vmem>>, vector<1x8x128xbf16>
      %54 = vector.shape_cast %53 : vector<1x8x128xbf16> to vector<8x128xbf16>
      %55 = vector.shape_cast %52 : vector<8x128xbf16> to vector<1x8x128xbf16>
      tpu.vector_store %arg8[%c0_24, %c0_25, %c0_26], %55 {strides = array<i32>} : memref<1x8x128xbf16, #tpu.memory_space<vmem>>, vector<1x8x128xbf16>,
      %56 = vector.broadcast %24 : vector<1x128xf32> to vector<8x128xf32>
      %57 = arith.addf %21, %56 : vector<8x128xf32>
      %58 = arith.truncf %57 : vector<8x128xf32> to vector<8x128xbf16>
      %c0_27 = arith.constant 0 : index
      %c0_28 = arith.constant 0 : index
      %c0_29 = arith.constant 0 : index
      %59 = vector.load %arg6[%c0_27, %c0_28, %c0_29] : memref<1x8x128xbf16, #tpu.memory_space<vmem>>, vector<1x8x128xbf16>
      %60 = vector.shape_cast %59 : vector<1x8x128xbf16> to vector<8x128xbf16>
      %61 = vector.shape_cast %58 : vector<8x128xbf16> to vector<1x8x128xbf16>
      tpu.vector_store %arg6[%c0_27, %c0_28, %c0_29], %61 {strides = array<i32>} : memref<1x8x128xbf16, #tpu.memory_space<vmem>>, vector<1x8x128xbf16>,
    } else {
    }
    %c0 = arith.constant 0 : index
    %c0_1 = arith.constant 0 : index
    %c0_2 = arith.constant 0 : index
    %3 = vector.load %arg8[%c0, %c0_1, %c0_2] : memref<1x8x128xbf16, #tpu.memory_space<vmem>>, vector<1x8x128xbf16>
    %4 = vector.shape_cast %3 : vector<1x8x128xbf16> to vector<8x128xbf16>
    %c0_3 = arith.constant 0 : index
    %c0_4 = arith.constant 0 : index
    %c0_5 = arith.constant 0 : index
    %5 = vector.load %arg5[%c0_3, %c0_4, %c0_5] : memref<1x128x128xbf16, #tpu.memory_space<vmem>>, vector<1x128x128xbf16>
    %6 = vector.shape_cast %5 : vector<1x128x128xbf16> to vector<128x128xbf16>
    %cst = arith.constant dense<0.000000e+00> : vector<8x128xf32>
    %7 = tpu.matmul %4, %6, %cst {dimension_numbers = #tpu.dot_dimension_numbers<[1], [0], [0], [1], [0, 0, 1, 1], [], []>} : vector<8x128xbf16>, vector<128x128xbf16>, vector<8x128xf32> -> vector<8x128xf32>
    %8 = arith.truncf %7 : vector<8x128xf32> to vector<8x128xbf16>
    %c0_6 = arith.constant 0 : index
    %c0_7 = arith.constant 0 : index
    %c0_8 = arith.constant 0 : index
    %9 = vector.load %arg7[%c0_6, %c0_7, %c0_8] : memref<1x8x128xbf16, #tpu.memory_space<vmem>>, vector<1x8x128xbf16>
    %10 = vector.shape_cast %9 : vector<1x8x128xbf16> to vector<8x128xbf16>
    %11 = vector.shape_cast %8 : vector<8x128xbf16> to vector<1x8x128xbf16>
    tpu.vector_store %arg7[%c0_6, %c0_7, %c0_8], %11 {strides = array<i32>} : memref<1x8x128xbf16, #tpu.memory_space<vmem>>, vector<1x8x128xbf16>,
    return
  }
  func.func @transform_0(%arg0: i32, %arg1: i32) -> (i32, i32, i32) {
    %c0_i32 = arith.constant 0 : i32
    %c0_i32_0 = arith.constant 0 : i32
    %c0_i32_1 = arith.constant 0 : i32
    return %arg0, %c0_i32, %c0_i32_0 : i32, i32, i32
  }
  func.func @transform_1(%arg0: i32, %arg1: i32) -> (i32, i32, i32) {
    %c0_i32 = arith.constant 0 : i32
    %c0_i32_0 = arith.constant 0 : i32
    %c0_i32_1 = arith.constant 0 : i32
    return %arg0, %c0_i32, %c0_i32_0 : i32, i32, i32
  }
  func.func @transform_2(%arg0: i32, %arg1: i32) -> (i32, i32, i32) {
    %c0_i32 = arith.constant 0 : i32
    %c0_i32_0 = arith.constant 0 : i32
    %c0_i32_1 = arith.constant 0 : i32
    return %arg0, %c0_i32, %c0_i32_0 : i32, i32, i32
  }
  func.func @transform_3(%arg0: i32, %arg1: i32) -> (i32, i32, i32) {
    %c0_i32 = arith.constant 0 : i32
    %c0_i32_0 = arith.constant 0 : i32
    return %arg0, %c0_i32, %arg1 : i32, i32, i32
  }
  func.func @transform_4(%arg0: i32, %arg1: i32) -> (i32, i32, i32) {
    %c0_i32 = arith.constant 0 : i32
    %c0_i32_0 = arith.constant 0 : i32
    %c0_i32_1 = arith.constant 0 : i32
    return %arg0, %c0_i32, %c0_i32_0 : i32, i32, i32
  }
  func.func @transform_5(%arg0: i32, %arg1: i32) -> (i32, i32, i32) {
    %c0_i32 = arith.constant 0 : i32
    %c0_i32_0 = arith.constant 0 : i32
    return %arg0, %c0_i32, %arg1 : i32, i32, i32
  }
}

</mosaic_0001>

<bundles_post_ra>
// kernel: part_based_forward.3
= control target key start
LH: loop header
LB: loop body
LE: loop exit
PB: predicated region body
PF: predicated region fallthrough
CT: control target
= control target key end

     0   :  { %s923_s18 = smov 0   ;;  %s925_s19 = smov 0   ;;  %s1001_s0 = inlined_call_operand.vmem [shape: bf16[5,8,128], index: 0, kind: input, shape index: {}]   ;;  %s1002_s1 = inlined_call_operand.vmem [shape: bf16[5,128,128], index: 1, kind: input, shape index: {}]   ;;  %s1003_s2 = inlined_call_operand.vmem [shape: f32[5,3,128], index: 2, kind: input, shape index: {}]   ;;  %s1004_s3 = inlined_call_operand.vmem [shape: bf16[5,128,128], index: 3, kind: input, shape index: {}]   ;;  %s1005_s4 = inlined_call_operand.vmem [shape: bf16[5,8,128], index: 4, kind: output, shape index: {0}]   ;;  %s1006_s5 = inlined_call_operand.vmem [shape: bf16[5,8,128], index: 5, kind: output, shape index: {1}]  }
   0x1   :  { %s927_s20 = smov 0  }
   0x2 LB: > { %s28_s21 = sadd.s32 1, %s885_s19  ;;  %p735_p0 = scmp.ge.s32.totalorder %s889_s20, 1  ;;  %s889_s20 = sphi %s927_s20, %s16_s20   ;;  %s885_s19 = sphi %s925_s19, %s1008_s19   ;;  %s881_s18 = sphi %s923_s18, %s1007_s18  }
   0x3   : > { %p30_p1 = scmp.ge.s32.totalorder %s28_s21, 5  ;;  %p237_p2 = scmp.lt.s32.totalorder %s889_s20, 6 }
   0x5   : > { %s1010_s21 = smov (%p30_p1, %s28_s21), 0  ;;  %p238_p3 = pnand %p735_p0, %p237_p2 }
   0x6   : > { %p287_p4 = scmp.lt.s32.totalorder (!%p238_p3), %s881_s18, 4 }
   0x7   : > { %241 = sbr.rel (%p238_p3) target bundleno = 513 (0x201), region = 36 }
   0xc   : > { %v891_v0 = vmov 0.0   ;;  %vm892_vm0 = vmmov 0   ;;  %s1012_s18 = smov (!%p287_p4, %s881_s18), 4  ;;  %v324_v18 = vlaneseq }
   0xd   : > { %783 = vmatprep.subr.bf16.mxu0 %v891_v0  ;;  %799 = vmatprep.mubr.msk.bf16.mxu0 %vm892_vm0, %v891_v0  ;;  %s763_s22 = sshll.u32 %s1012_s18, 6  ;;  %s960_s26 = sshll.u32 %s1012_s18, 2 }
   0xe   : > { %803 = vmatprep.subr.bf16.mxu1 %v891_v0  ;;  %819 = vmatprep.mubr.msk.bf16.mxu1 %vm892_vm0, %v891_v0  ;;  %s295_s25 = scalar_lea.vmem %s1002_s1, %s763_s22  ;;  %s290_s29 = scalar_lea.vmem %s1001_s0, %s960_s26  ;;  %v325_v19 = vshrl.u32 %v324_v18, 7 }
   0xf   : > { %v849_v1 = vld [vmem:[%s295_s25 + $0x38] sm:$0xff]   ;;  %v850_v2 = vld [vmem:[%s295_s25 + $0x30] sm:$0xff]   ;;  %v851_v3 = vld [vmem:[%s295_s25 + $0x28] sm:$0xff]   ;;  %s307_s7 = scalar_lea.vmem %s1004_s3, %s763_s22  ;;  %s299_s10 = scalar_lea.vmem %s1003_s2, %s960_s26 }
  0x10   : > { %784 = vmatpush3.bf16.msra.mxu0 %v849_v1  ;;  %v852_v4 = vld [vmem:[%s295_s25 + $0x20] sm:$0xff]   ;;  %v853_v5 = vld [vmem:[%s295_s25 + $0x18] sm:$0xff]   ;;  %v854_v6 = vld [vmem:[%s295_s25 + $0x10] sm:$0xff]   ;;  %v475_v20 = vsub.s32 0, %v325_v19  ;;  %vm326_vm1 = vcmp.lt.s32.totalorder %v325_v19, 4  ;;  %s311_s13 = scalar_lea.vmem %s1005_s4, %s960_s26  ;;  %v463_v51 = vsub.s32 1, %v325_v19  ;;  %s318_s16 = scalar_lea.vmem %s1006_s5, %s960_s26 }
  0x11   : > { %785 = vmatprep.subr.bf16.mxu0 %v891_v0  ;;  %v855_v7 = vld [vmem:[%s295_s25 + $0x8] sm:$0xff]   ;;  %v856_v8 = vld [vmem:[%s295_s25] sm:$0xff]   ;;  %v857_v10 = vld [vmem:[%s307_s7 + $0x38] sm:$0xff]   ;;  %v744_v23 = vsel %vm326_vm1, 1.0, %v891_v0  ;;  %v468_v55 = vsub.s32 2, %v325_v19 }
  0x12   : > { %v329_v9 = vld [vmem:[%s290_s29] sm:$0xf]  ;;  %804 = vmatpush3.bf16.msra.mxu1 %v857_v10  ;;  %v858_v11 = vld [vmem:[%s307_s7 + $0x30] sm:$0xff]   ;;  %v859_v12 = vld [vmem:[%s307_s7 + $0x28] sm:$0xff]  }
  0x13   : > { %805 = vmatprep.subr.bf16.mxu1 %v891_v0  ;;  %v860_v13 = vld [vmem:[%s307_s7 + $0x20] sm:$0xff]   ;;  %v861_v14 = vld [vmem:[%s307_s7 + $0x18] sm:$0xff]   ;;  %v862_v15 = vld [vmem:[%s307_s7 + $0x10] sm:$0xff]  }
  0x14   : > { %786 = vmatpush3.bf16.msra.mxu0 %v850_v2  ;;  %v863_v16 = vld [vmem:[%s307_s7 + $0x8] sm:$0xff]   ;;  %v864_v17 = vld [vmem:[%s307_s7] sm:$0xff]  }
  0x15   : > { %787 = vmatprep.subr.bf16.mxu0 %v891_v0  ;;  %v434_v21 = vld [vmem:[%s299_s10] sm:$0x7] }
  0x16   : > { %806 = vmatpush3.bf16.msra.mxu1 %v858_v11  ;;  %v476_v22 = vrot.slane %v434_v21, %v475_v20 }
  0x17   : > { %807 = vmatprep.subr.bf16.mxu1 %v891_v0 }
  0x18   : > { %788 = vmatpush3.bf16.msra.mxu0 %v851_v3 }
  0x19   : > { %789 = vmatprep.subr.bf16.mxu0 %v891_v0 }
  0x1a   : > { %808 = vmatpush3.bf16.msra.mxu1 %v859_v12 }
  0x1b   : > { %809 = vmatprep.subr.bf16.mxu1 %v891_v0 }
  0x1c   : > { %790 = vmatpush3.bf16.msra.mxu0 %v852_v4 }
  0x1d   : > { %791 = vmatprep.subr.bf16.mxu0 %v891_v0 }
  0x1e   : > { %810 = vmatpush3.bf16.msra.mxu1 %v860_v13 }
  0x1f   : > { %811 = vmatprep.subr.bf16.mxu1 %v891_v0 }
  0x20   : > { %792 = vmatpush3.bf16.msra.mxu0 %v853_v5 }
  0x21   : > { %793 = vmatprep.subr.bf16.mxu0 %v891_v0 }
  0x22   : > { %812 = vmatpush3.bf16.msra.mxu1 %v861_v14 }
  0x23   : > { %813 = vmatprep.subr.bf16.mxu1 %v891_v0 }
  0x24   : > { %794 = vmatpush3.bf16.msra.mxu0 %v854_v6 }
  0x25   : > { %795 = vmatprep.subr.bf16.mxu0 %v891_v0 }
  0x26   : > { %814 = vmatpush3.bf16.msra.mxu1 %v862_v15 }
  0x27   : > { %815 = vmatprep.subr.bf16.mxu1 %v891_v0 }
  0x28   : > { %796 = vmatpush3.bf16.msra.mxu0 %v855_v7 }
  0x29   : > { %797 = vmatprep.subr.bf16.mxu0 %v891_v0 }
  0x2a   : > { %816 = vmatpush3.bf16.msra.mxu1 %v863_v16 }
  0x2b   : > { %817 = vmatprep.subr.bf16.mxu1 %v891_v0 }
  0x2c   : > { %798 = vmatpush3.bf16.msra.mxu0 %v856_v8 }
  0x2e   : > { %818 = vmatpush3.bf16.msra.mxu1 %v864_v17 }
  0x2f   : > { %800 = vmatmul.mubr.bf16.vlgmr.msra.gmra.mxu0 %v329_v9 }
  0xef   : > { %v428_v24 = vpop.f32.mrf.mxu0 }
  0xf0   : > { %v435_v25 = vmul.f32 %v744_v23, %v428_v24  ;;  %v477_v26 = vadd.f32 %v476_v22, %v428_v24 }
  0xf1   : > { %v801_v27 = vpop.f32.mrf.mxu0 }
  0xf2   : > { %v436_v28 = vrot.slane %v435_v25, 4  ;;  %v478_v29 = vpack.c.bf16 %v477_v26, %v477_v26 }
  0xf3   : > { %v431_v30 = vpop.f32.mrf.mxu0 }
  0xf4   : > { %v437_v31 = vadd.f32 %v436_v28, %v435_v25  ;;  %479 = vst [vmem:[%s311_s13] sm:$0xf] %v478_v29 }
  0xf5   : > { %v802_v32 = vpop.f32.mrf.mxu0 }
  0xf6   : > { %v438_v33 = vrot.slane %v437_v31, 2 }
  0xf8   : > { %v439_v34 = vadd.f32 %v438_v33, %v437_v31 }
  0xfa   : > { %v440_v35 = vrot.slane %v439_v34, 1 }
  0xfc   : > { %v441_v36 = vadd.f32 %v440_v35, %v439_v34 }
  0xfe   : > { %v442_v37 = vmul.f32 0.25, %v441_v36 }
 0x100   : > { %v443_v38 = vsub.f32 %v428_v24, %v442_v37 }
 0x102   : > { %v444_v39 = vmul.f32 %v744_v23, %v443_v38 }
 0x104   : > { %v445_v40 = vmul.f32 %v444_v39, %v444_v39 }
 0x106   : > { %v446_v41 = vrot.slane %v445_v40, 4 }
 0x108   : > { %v447_v42 = vadd.f32 %v446_v41, %v445_v40 }
 0x10a   : > { %v448_v43 = vrot.slane %v447_v42, 2 }
 0x10c   : > { %v449_v44 = vadd.f32 %v448_v43, %v447_v42 }
 0x10e   : > { %v450_v45 = vrot.slane %v449_v44, 1 }
 0x110   : > { %v451_v46 = vadd.f32 %v450_v45, %v449_v44 }
 0x112   : > { %v452_v47 = vmul.f32 0.25, %v451_v46 }
 0x114   : > { %v453_v48 = vadd.f32 1e-05, %v452_v47 }
 0x116   : > { %865 = vrsqrt.f32 %v453_v48 }
 0x123   : > { %v866_v49 = vpop.eup %865 }
 0x124   : > { %v455_v50 = vmul.f32 %v866_v49, %v434_v21 }
 0x126   : > { %v456_v52 = vmul.f32 %v455_v50, %v442_v37  ;;  %v464_v54 = vrot.slane %v455_v50, %v463_v51 }
 0x128   : > { %v458_v53 = vrot.slane %v456_v52, 7  ;;  %v465_v57 = vmul.f32 %v464_v54, %v428_v24 }
 0x12a   : > { %v460_v56 = vsub.f32 %v434_v21, %v458_v53 }
 0x12c   : > { %v469_v58 = vrot.slane %v460_v56, %v468_v55 }
 0x12e   : > { %v470_v59 = vadd.f32 %v469_v58, %v465_v57 }
 0x130   : > { %v471_v60 = vpack.c.bf16 %v470_v59, %v470_v59 }
 0x132   : > { %472 = vst [vmem:[#allocation2] sm:$0xf] %v471_v60 }
 0x139   : > { %v480_v61 = vld [vmem:[#allocation2] sm:$0xf] }
 0x13a   : > { %820 = vmatmul.mubr.bf16.vlgmr.msra.gmra.mxu1 %v480_v61 }
 0x1fa   : > { %v579_v62 = vpop.f32.mrf.mxu1 }
 0x1fb   : > { %v585_v63 = vpack.c.bf16 %v579_v62, %v579_v62 }
 0x1fc   : > { %v821_v0 = vpop.f32.mrf.mxu1 }
 0x1fd   : > { %586 = vst [vmem:[%s318_s16] sm:$0xf] %v585_v63 }
 0x1fe   : > { %v582_v1 = vpop.f32.mrf.mxu1 }
 0x200   : > { %v822_v2 = vpop.f32.mrf.mxu1 }
 0x201 PF: > { %s16_s20 = sadd.s32 1, %s889_s20   ;;  %s1007_s18 = smov %s885_s19 }
 0x202   : > { %p13_p5 = scmp.ge.s32.totalorder %s16_s20, 7   ;;  %s1008_s19 = smov %s1010_s21 }
 0x204   :  { %15 = sbr.rel (!%p13_p5) target bundleno = 2 (0x2), region = 91 }

// kernel: part_based_forward.5
= control target key start
LH: loop header
LB: loop body
LE: loop exit
PB: predicated region body
PF: predicated region fallthrough
CT: control target
= control target key end

     0   :  { %v1172_v0 = vmov 0.0   ;;  %vm1173_vm0 = vmmov 0   ;;  %v24_v42 = vlaneseq  ;;  %s1486_s1 = inlined_call_operand.vmem [shape: bf16[3,128,128], index: 1, kind: input, shape index: {}]   ;;  %s1487_s0 = inlined_call_operand.vmem [shape: bf16[1,8,128], index: 0, kind: input, shape index: {}]   ;;  %s1488_s3 = inlined_call_operand.vmem [shape: bf16[3,128,128], index: 3, kind: input, shape index: {}]   ;;  %s1489_s2 = inlined_call_operand.vmem [shape: f32[3,3,128], index: 2, kind: input, shape index: {}]   ;;  %s1490_s4 = inlined_call_operand.vmem [shape: bf16[3,8,128], index: 4, kind: output, shape index: {0}]   ;;  %s1491_s5 = inlined_call_operand.vmem [shape: bf16[3,8,128], index: 5, kind: output, shape index: {1}]  }
   0x1   :  { %996 = vmatprep.subr.bf16.mxu0 %v1172_v0  ;;  %1016 = vmatprep.subr.bf16.mxu1 %v1172_v0  ;;  %v1118_v1 = vld [vmem:[%s1486_s1 + $0x38] sm:$0xff]   ;;  %v1120_v3 = vld [vmem:[%s1486_s1 + $0x30] sm:$0xff]   ;;  %v1122_v5 = vld [vmem:[%s1486_s1 + $0x28] sm:$0xff]  }
   0x2   :  { %v1119_v2 = vld [vmem:[%s1486_s1 + $0x78] sm:$0xff]   ;;  %1012 = vmatprep.mubr.msk.bf16.mxu0 %vm1173_vm0, %v1172_v0  ;;  %1032 = vmatprep.mubr.msk.bf16.mxu1 %vm1173_vm0, %v1172_v0  ;;  %v1121_v4 = vld [vmem:[%s1486_s1 + $0x70] sm:$0xff]   ;;  %v1123_v6 = vld [vmem:[%s1486_s1 + $0x68] sm:$0xff]   ;;  %v1378_v43 = vshrl.u32 %v24_v42, 7 }
   0x3   :  { %997 = vmatpush3.bf16.msra.mxu0 %v1118_v1  ;;  %1017 = vmatpush3.bf16.msra.mxu1 %v1119_v2  ;;  %v1124_v7 = vld [vmem:[%s1486_s1 + $0x20] sm:$0xff]   ;;  %v1126_v9 = vld [vmem:[%s1486_s1 + $0x18] sm:$0xff]   ;;  %v1128_v11 = vld [vmem:[%s1486_s1 + $0x10] sm:$0xff]  }
   0x4   :  { %998 = vmatprep.subr.bf16.mxu0 %v1172_v0  ;;  %1018 = vmatprep.subr.bf16.mxu1 %v1172_v0  ;;  %v1125_v8 = vld [vmem:[%s1486_s1 + $0x60] sm:$0xff]   ;;  %v1127_v10 = vld [vmem:[%s1486_s1 + $0x58] sm:$0xff]   ;;  %v1129_v12 = vld [vmem:[%s1486_s1 + $0x50] sm:$0xff]   ;;  %v175_v44 = vsub.s32 0, %v1378_v43  ;;  %vm26_vm1 = vcmp.lt.s32.totalorder %v1378_v43, 4 }
   0x5   :  { %v1130_v13 = vld [vmem:[%s1486_s1 + $0x8] sm:$0xff]   ;;  %v1132_v15 = vld [vmem:[%s1486_s1] sm:$0xff]   ;;  %v1134_v18 = vld [vmem:[%s1486_s1 + $0xb8] sm:$0xff]   ;;  %v1394_v48 = vsel %vm26_vm1, 1.0, %v1172_v0 }
   0x6   :  { %v1131_v14 = vld [vmem:[%s1486_s1 + $0x48] sm:$0xff]   ;;  %v1133_v16 = vld [vmem:[%s1486_s1 + $0x40] sm:$0xff]   ;;  %v1135_v19 = vld [vmem:[%s1486_s1 + $0xb0] sm:$0xff]  }
   0x7   :  { %999 = vmatpush3.bf16.msra.mxu0 %v1120_v3  ;;  %1019 = vmatpush3.bf16.msra.mxu1 %v1121_v4  ;;  %v29_v17 = vld [vmem:[%s1487_s0] sm:$0xf]  ;;  %v1136_v20 = vld [vmem:[%s1486_s1 + $0xa8] sm:$0xff]   ;;  %v1138_v22 = vld [vmem:[%s1486_s1 + $0x98] sm:$0xff]  }
   0x8   :  { %1000 = vmatprep.subr.bf16.mxu0 %v1172_v0  ;;  %1020 = vmatprep.subr.bf16.mxu1 %v1172_v0  ;;  %v1137_v21 = vld [vmem:[%s1486_s1 + $0xa0] sm:$0xff]   ;;  %v1139_v23 = vld [vmem:[%s1486_s1 + $0x90] sm:$0xff]   ;;  %v1140_v24 = vld [vmem:[%s1486_s1 + $0x88] sm:$0xff]  }
   0x9   :  { %v1141_v25 = vld [vmem:[%s1486_s1 + $0x80] sm:$0xff]   ;;  %v1142_v26 = vld [vmem:[%s1488_s3 + $0x38] sm:$0xff]   ;;  %v1144_v28 = vld [vmem:[%s1488_s3 + $0x30] sm:$0xff]  }
   0xa   :  { %v1143_v27 = vld [vmem:[%s1488_s3 + $0x78] sm:$0xff]   ;;  %v1145_v29 = vld [vmem:[%s1488_s3 + $0x70] sm:$0xff]   ;;  %v1146_v30 = vld [vmem:[%s1488_s3 + $0x28] sm:$0xff]  }
   0xb   :  { %1001 = vmatpush3.bf16.msra.mxu0 %v1122_v5  ;;  %1021 = vmatpush3.bf16.msra.mxu1 %v1123_v6  ;;  %v1147_v31 = vld [vmem:[%s1488_s3 + $0x68] sm:$0xff]   ;;  %v1148_v32 = vld [vmem:[%s1488_s3 + $0x20] sm:$0xff]   ;;  %v1150_v34 = vld [vmem:[%s1488_s3 + $0x18] sm:$0xff]  }
   0xc   :  { %1002 = vmatprep.subr.bf16.mxu0 %v1172_v0  ;;  %1022 = vmatprep.subr.bf16.mxu1 %v1172_v0  ;;  %v1149_v33 = vld [vmem:[%s1488_s3 + $0x60] sm:$0xff]   ;;  %v1151_v35 = vld [vmem:[%s1488_s3 + $0x58] sm:$0xff]   ;;  %v1152_v36 = vld [vmem:[%s1488_s3 + $0x10] sm:$0xff]  }
   0xd   :  { %v1153_v37 = vld [vmem:[%s1488_s3 + $0x50] sm:$0xff]   ;;  %v1154_v38 = vld [vmem:[%s1488_s3 + $0x8] sm:$0xff]   ;;  %v1156_v40 = vld [vmem:[%s1488_s3] sm:$0xff]  }
   0xe   :  { %v1155_v39 = vld [vmem:[%s1488_s3 + $0x48] sm:$0xff]   ;;  %v1157_v41 = vld [vmem:[%s1488_s3 + $0x40] sm:$0xff]  }
   0xf   :  { %1003 = vmatpush3.bf16.msra.mxu0 %v1124_v7  ;;  %1023 = vmatpush3.bf16.msra.mxu1 %v1125_v8  ;;  %v1384_v45 = vld [vmem:[%s1489_s2] sm:$0x7]  ;;  %v1390_v46 = vld [vmem:[%s1489_s2 + $0x4] sm:$0x7] }
  0x10   :  { %1004 = vmatprep.subr.bf16.mxu0 %v1172_v0  ;;  %1024 = vmatprep.subr.bf16.mxu1 %v1172_v0  ;;  %v176_v47 = vrot.slane %v1384_v45, %v175_v44  ;;  %v329_v49 = vrot.slane %v1390_v46, %v175_v44 }
  0x13   :  { %1005 = vmatpush3.bf16.msra.mxu0 %v1126_v9  ;;  %1025 = vmatpush3.bf16.msra.mxu1 %v1127_v10 }
  0x14   :  { %1006 = vmatprep.subr.bf16.mxu0 %v1172_v0  ;;  %1026 = vmatprep.subr.bf16.mxu1 %v1172_v0 }
  0x17   :  { %1007 = vmatpush3.bf16.msra.mxu0 %v1128_v11  ;;  %1027 = vmatpush3.bf16.msra.mxu1 %v1129_v12 }
  0x18   :  { %1008 = vmatprep.subr.bf16.mxu0 %v1172_v0  ;;  %1028 = vmatprep.subr.bf16.mxu1 %v1172_v0 }
  0x1b   :  { %1009 = vmatpush3.bf16.msra.mxu0 %v1130_v13  ;;  %1029 = vmatpush3.bf16.msra.mxu1 %v1131_v14 }
  0x1c   :  { %1010 = vmatprep.subr.bf16.mxu0 %v1172_v0  ;;  %1030 = vmatprep.subr.bf16.mxu1 %v1172_v0 }
  0x1f   :  { %1011 = vmatpush3.bf16.msra.mxu0 %v1132_v15  ;;  %1031 = vmatpush3.bf16.msra.mxu1 %v1133_v16 }
  0x20   :  { %1036 = vmatprep.subr.bf16.mxu0 %v1172_v0  ;;  %1056 = vmatprep.subr.bf16.mxu1 %v1172_v0 }
  0x22   :  { %1013 = vmatmul.mubr.bf16.vlgmr.msra.gmra.mxu0 %v29_v17  ;;  %1033 = vmatmul.mubr.bf16.vlgmr.msra.gmra.mxu1 %v29_v17 }
  0x23   :  { %1037 = vmatpush3.bf16.msra.mxu0 %v1134_v18  ;;  %1052 = vmatprep.mubr.msk.bf16.mxu0 %vm1173_vm0, %v1172_v0 }
  0x24   :  { %1038 = vmatprep.subr.bf16.mxu0 %v1172_v0  ;;  %1072 = vmatprep.mubr.msk.bf16.mxu1 %vm1173_vm0, %v1172_v0 }
  0x25   :  { %1057 = vmatpush3.bf16.msra.mxu1 %v1142_v26 }
  0x26   :  { %1058 = vmatprep.subr.bf16.mxu1 %v1172_v0 }
  0x27   :  { %1039 = vmatpush3.bf16.msra.mxu0 %v1135_v19 }
  0x28   :  { %1040 = vmatprep.subr.bf16.mxu0 %v1172_v0 }
  0x29   :  { %1059 = vmatpush3.bf16.msra.mxu1 %v1144_v28 }
  0x2a   :  { %1060 = vmatprep.subr.bf16.mxu1 %v1172_v0 }
  0x2b   :  { %1041 = vmatpush3.bf16.msra.mxu0 %v1136_v20 }
  0x2c   :  { %1042 = vmatprep.subr.bf16.mxu0 %v1172_v0 }
  0x2d   :  { %1061 = vmatpush3.bf16.msra.mxu1 %v1146_v30 }
  0x2e   :  { %1062 = vmatprep.subr.bf16.mxu1 %v1172_v0 }
  0x2f   :  { %1043 = vmatpush3.bf16.msra.mxu0 %v1137_v21 }
  0x30   :  { %1044 = vmatprep.subr.bf16.mxu0 %v1172_v0 }
  0x31   :  { %1063 = vmatpush3.bf16.msra.mxu1 %v1148_v32 }
  0x32   :  { %1064 = vmatprep.subr.bf16.mxu1 %v1172_v0 }
  0x33   :  { %1045 = vmatpush3.bf16.msra.mxu0 %v1138_v22 }
  0x34   :  { %1046 = vmatprep.subr.bf16.mxu0 %v1172_v0 }
  0x35   :  { %1065 = vmatpush3.bf16.msra.mxu1 %v1150_v34 }
  0x36   :  { %1066 = vmatprep.subr.bf16.mxu1 %v1172_v0 }
  0x37   :  { %1047 = vmatpush3.bf16.msra.mxu0 %v1139_v23 }
  0x38   :  { %1048 = vmatprep.subr.bf16.mxu0 %v1172_v0 }
  0x39   :  { %1067 = vmatpush3.bf16.msra.mxu1 %v1152_v36 }
  0x3a   :  { %1068 = vmatprep.subr.bf16.mxu1 %v1172_v0 }
  0x3b   :  { %1049 = vmatpush3.bf16.msra.mxu0 %v1140_v24 }
  0x3c   :  { %1050 = vmatprep.subr.bf16.mxu0 %v1172_v0 }
  0x3d   :  { %1069 = vmatpush3.bf16.msra.mxu1 %v1154_v38 }
  0x3e   :  { %1070 = vmatprep.subr.bf16.mxu1 %v1172_v0 }
  0x3f   :  { %1051 = vmatpush3.bf16.msra.mxu0 %v1141_v25  ;;  %v1420_v25 = vld [vmem:[%s1489_s2 + $0x8] sm:$0x7] }
  0x40   :  { %1076 = vmatprep.subr.bf16.mxu0 %v1172_v0 }
  0x41   :  { %1071 = vmatpush3.bf16.msra.mxu1 %v1156_v40 }
  0x42   :  { %1053 = vmatmul.mubr.bf16.vlgmr.msra.gmra.mxu0 %v29_v17  ;;  %1096 = vmatprep.subr.bf16.mxu1 %v1172_v0 }
  0x43   :  { %1092 = vmatprep.mubr.msk.bf16.mxu0 %vm1173_vm0, %v1172_v0  ;;  %1077 = vmatpush3.bf16.msra.mxu0 %v1143_v27 }
  0x44   :  { %1078 = vmatprep.subr.bf16.mxu0 %v1172_v0 }
  0x47   :  { %1079 = vmatpush3.bf16.msra.mxu0 %v1145_v29  ;;  %v483_v29 = vrot.slane %v1420_v25, %v175_v44 }
  0x48   :  { %1080 = vmatprep.subr.bf16.mxu0 %v1172_v0 }
  0x4b   :  { %1081 = vmatpush3.bf16.msra.mxu0 %v1147_v31 }
  0x4c   :  { %1082 = vmatprep.subr.bf16.mxu0 %v1172_v0 }
  0x4f   :  { %1083 = vmatpush3.bf16.msra.mxu0 %v1149_v33 }
  0x50   :  { %1084 = vmatprep.subr.bf16.mxu0 %v1172_v0 }
  0x53   :  { %1085 = vmatpush3.bf16.msra.mxu0 %v1151_v35 }
  0x54   :  { %1086 = vmatprep.subr.bf16.mxu0 %v1172_v0 }
  0x57   :  { %1087 = vmatpush3.bf16.msra.mxu0 %v1153_v37 }
  0x58   :  { %1088 = vmatprep.subr.bf16.mxu0 %v1172_v0 }
  0x5b   :  { %1089 = vmatpush3.bf16.msra.mxu0 %v1155_v39 }
  0x5c   :  { %1090 = vmatprep.subr.bf16.mxu0 %v1172_v0 }
  0x5f   :  { %1091 = vmatpush3.bf16.msra.mxu0 %v1157_v41 }
  0xe2   :  { %v1397_v50 = vpop.f32.mrf.mxu0  ;;  %v1402_v53 = vpop.f32.mrf.mxu1 }
  0xe3   :  { %v135_v51 = vmul.f32 %v1394_v48, %v1397_v50  ;;  %v177_v52 = vadd.f32 %v176_v47, %v1397_v50  ;;  %v287_v54 = vmul.f32 %v1394_v48, %v1402_v53  ;;  %v330_v55 = vadd.f32 %v329_v49, %v1402_v53 }
  0xe4   :  { %v1014_v56 = vpop.f32.mrf.mxu0  ;;  %v1034_v59 = vpop.f32.mrf.mxu1 }
  0xe5   :  { %v136_v57 = vrot.slane %v135_v51, 4  ;;  %v178_v58 = vpack.c.bf16 %v177_v52, %v177_v52  ;;  %v288_v60 = vrot.slane %v287_v54, 4  ;;  %v331_v61 = vpack.c.bf16 %v330_v55, %v330_v55 }
  0xe6   :  { %v131_v62 = vpop.f32.mrf.mxu0  ;;  %v282_v1 = vpop.f32.mrf.mxu1 }
  0xe7   :  { %v137_v63 = vadd.f32 %v136_v57, %v135_v51  ;;  %179 = vst [vmem:[%s1490_s4] sm:$0xf] %v178_v58  ;;  %v289_v2 = vadd.f32 %v288_v60, %v287_v54  ;;  %857 = vst [vmem:[%s1490_s4 + $0x4] sm:$0xf] %v331_v61  ;;  %v163_v1 = vsub.s32 1, %v1378_v43 }
  0xe8   :  { %v1015_v3 = vpop.f32.mrf.mxu0  ;;  %v1035_v5 = vpop.f32.mrf.mxu1 }
  0xe9   :  { %v138_v4 = vrot.slane %v137_v63, 2  ;;  %v290_v6 = vrot.slane %v289_v2, 2 }
  0xeb   :  { %v139_v7 = vadd.f32 %v138_v4, %v137_v63  ;;  %v291_v8 = vadd.f32 %v290_v6, %v289_v2 }
  0xed   :  { %v140_v9 = vrot.slane %v139_v7, 1  ;;  %v292_v10 = vrot.slane %v291_v8, 1 }
  0xef   :  { %v141_v11 = vadd.f32 %v140_v9, %v139_v7  ;;  %v293_v12 = vadd.f32 %v292_v10, %v291_v8  ;;  %v168_v9 = vsub.s32 2, %v1378_v43 }
  0xf1   :  { %v142_v13 = vmul.f32 0.25, %v141_v11  ;;  %v294_v14 = vmul.f32 0.25, %v293_v12 }
  0xf3   :  { %v143_v15 = vsub.f32 %v1397_v50, %v142_v13  ;;  %v295_v16 = vsub.f32 %v1402_v53, %v294_v14 }
  0xf5   :  { %v144_v17 = vmul.f32 %v1394_v48, %v143_v15  ;;  %v296_v18 = vmul.f32 %v1394_v48, %v295_v16 }
  0xf7   :  { %v145_v19 = vmul.f32 %v144_v17, %v144_v17  ;;  %v297_v20 = vmul.f32 %v296_v18, %v296_v18 }
  0xf9   :  { %v146_v21 = vrot.slane %v145_v19, 4  ;;  %v298_v22 = vrot.slane %v297_v20, 4 }
  0xfb   :  { %v147_v23 = vadd.f32 %v146_v21, %v145_v19  ;;  %v299_v24 = vadd.f32 %v298_v22, %v297_v20 }
  0xfd   :  { %v148_v26 = vrot.slane %v147_v23, 2  ;;  %v300_v27 = vrot.slane %v299_v24, 2 }
  0xff   :  { %v149_v28 = vadd.f32 %v148_v26, %v147_v23  ;;  %v301_v30 = vadd.f32 %v300_v27, %v299_v24 }
 0x101   :  { %v150_v31 = vrot.slane %v149_v28, 1  ;;  %v302_v32 = vrot.slane %v301_v30, 1 }
 0x102   :  { %v1423_v33 = vpop.f32.mrf.mxu0 }
 0x103   :  { %v151_v34 = vadd.f32 %v150_v31, %v149_v28  ;;  %v441_v35 = vmul.f32 %v1394_v48, %v1423_v33  ;;  %v484_v36 = vadd.f32 %v483_v29, %v1423_v33  ;;  %v303_v37 = vadd.f32 %v302_v32, %v301_v30  ;;  %v1160_v28 = vld [vmem:[%s1488_s3 + $0xa8] sm:$0xff]   ;;  %v1161_v30 = vld [vmem:[%s1488_s3 + $0xa0] sm:$0xff]  }
 0x104   :  { %v1054_v38 = vpop.f32.mrf.mxu0 }
 0x105   :  { %v152_v39 = vmul.f32 0.25, %v151_v34  ;;  %v442_v40 = vrot.slane %v441_v35, 4  ;;  %v485_v41 = vpack.c.bf16 %v484_v36, %v484_v36  ;;  %v304_v42 = vmul.f32 0.25, %v303_v37  ;;  %v1162_v34 = vld [vmem:[%s1488_s3 + $0x98] sm:$0xff]   ;;  %v1163_v38 = vld [vmem:[%s1488_s3 + $0x90] sm:$0xff]  }
 0x106   :  { %v436_v47 = vpop.f32.mrf.mxu0 }
 0x107   :  { %v153_v49 = vadd.f32 1e-05, %v152_v39  ;;  %v443_v44 = vadd.f32 %v442_v40, %v441_v35  ;;  %883 = vst [vmem:[%s1490_s4 + $0x8] sm:$0xf] %v485_v41  ;;  %v305_v51 = vadd.f32 1e-05, %v304_v42 }
 0x108   :  { %v1055_v52 = vpop.f32.mrf.mxu0  ;;  %v1164_v42 = vld [vmem:[%s1488_s3 + $0x88] sm:$0xff]  }
 0x109   :  { %1166 = vrsqrt.f32 %v153_v49  ;;  %v444_v54 = vrot.slane %v443_v44, 2 }
 0x10a   :  { %1168 = vrsqrt.f32 %v305_v51 }
 0x10b   :  { %v445_v55 = vadd.f32 %v444_v54, %v443_v44 }
 0x10d   :  { %v446_v56 = vrot.slane %v445_v55, 1 }
 0x10f   :  { %v447_v57 = vadd.f32 %v446_v56, %v445_v55 }
 0x111   :  { %v448_v58 = vmul.f32 0.25, %v447_v57 }
 0x113   :  { %v449_v59 = vsub.f32 %v1423_v33, %v448_v58 }
 0x115   :  { %v450_v60 = vmul.f32 %v1394_v48, %v449_v59 }
 0x116   :  { %v1167_v61 = vpop.eup %1166 }
 0x117   :  { %v1169_v62 = vpop.eup %1168  ;;  %v155_v63 = vmul.f32 %v1167_v61, %v1384_v45  ;;  %v451_v2 = vmul.f32 %v450_v60, %v450_v60 }
 0x118   :  { %v307_v3 = vmul.f32 %v1169_v62, %v1390_v46 }
 0x119   :  { %v156_v4 = vmul.f32 %v155_v63, %v142_v13  ;;  %v452_v5 = vrot.slane %v451_v2, 4  ;;  %v164_v8 = vrot.slane %v155_v63, %v163_v1 }
 0x11a   :  { %v308_v6 = vmul.f32 %v307_v3, %v294_v14  ;;  %v316_v12 = vrot.slane %v307_v3, %v163_v1 }
 0x11b   :  { %v158_v7 = vrot.slane %v156_v4, 7  ;;  %v453_v10 = vadd.f32 %v452_v5, %v451_v2  ;;  %v165_v17 = vmul.f32 %v164_v8, %v1397_v50 }
 0x11c   :  { %v310_v11 = vrot.slane %v308_v6, 7  ;;  %v317_v13 = vmul.f32 %v316_v12, %v1402_v53  ;;  %v1159_v53 = vld [vmem:[%s1488_s3 + $0xb0] sm:$0xff]  }
 0x11d   :  { %v160_v48 = vsub.f32 %v1384_v45, %v158_v7  ;;  %v454_v15 = vrot.slane %v453_v10, 2 }
 0x11e   :  { %v312_v16 = vsub.f32 %v1390_v46, %v310_v11  ;;  %v1158_v46 = vld [vmem:[%s1488_s3 + $0xb8] sm:$0xff]  }
 0x11f   :  { %v169_v18 = vrot.slane %v160_v48, %v168_v9  ;;  %v455_v19 = vadd.f32 %v454_v15, %v453_v10 }
 0x120   :  { %v321_v20 = vrot.slane %v312_v16, %v168_v9 }
 0x121   :  { %v170_v14 = vadd.f32 %v169_v18, %v165_v17  ;;  %v456_v21 = vrot.slane %v455_v19, 1 }
 0x122   :  { %v322_v22 = vadd.f32 %v321_v20, %v317_v13 }
 0x123   :  { %v171_v23 = vpack.c.bf16 %v170_v14, %v170_v14  ;;  %v457_v43 = vadd.f32 %v456_v21, %v455_v19 }
 0x124   :  { %v323_v24 = vpack.c.bf16 %v322_v22, %v322_v22 }
 0x125   :  { %172 = vst [vmem:[#allocation2] sm:$0xf] %v171_v23  ;;  %v458_v26 = vmul.f32 0.25, %v457_v43 }
 0x126   :  { %325 = vst [vmem:[#allocation2 + $0x4] sm:$0xf] %v323_v24 }
 0x127   :  { %v459_v45 = vadd.f32 1e-05, %v458_v26 }
 0x129   :  { %1170 = vrsqrt.f32 %v459_v45 }
 0x12c   :  { %v488_v50 = vld [vmem:[#allocation2] sm:$0xf] }
 0x12d   :  { %1073 = vmatmul.mubr.bf16.vlgmr.msra.gmra.mxu1 %v488_v50  ;;  %v596_v27 = vld [vmem:[#allocation2 + $0x4] sm:$0xf] }
 0x12e   :  { %1093 = vmatmul.mubr.bf16.vlgmr.msra.gmra.mxu0 %v596_v27  ;;  %1097 = vmatpush3.bf16.msra.mxu1 %v1158_v46 }
 0x12f   :  { %1098 = vmatprep.subr.bf16.mxu1 %v1172_v0  ;;  %1112 = vmatprep.mubr.msk.bf16.mxu1 %vm1173_vm0, %v1172_v0 }
 0x132   :  { %1099 = vmatpush3.bf16.msra.mxu1 %v1159_v53 }
 0x133   :  { %1100 = vmatprep.subr.bf16.mxu1 %v1172_v0 }
 0x136   :  { %v1171_v29 = vpop.eup %1170  ;;  %1101 = vmatpush3.bf16.msra.mxu1 %v1160_v28 }
 0x137   :  { %v461_v31 = vmul.f32 %v1171_v29, %v1420_v25  ;;  %1102 = vmatprep.subr.bf16.mxu1 %v1172_v0 }
 0x139   :  { %v462_v32 = vmul.f32 %v461_v31, %v448_v58  ;;  %v470_v36 = vrot.slane %v461_v31, %v163_v1 }
 0x13a   :  { %1103 = vmatpush3.bf16.msra.mxu1 %v1161_v30 }
 0x13b   :  { %v464_v35 = vrot.slane %v462_v32, 7  ;;  %1104 = vmatprep.subr.bf16.mxu1 %v1172_v0  ;;  %v471_v39 = vmul.f32 %v470_v36, %v1423_v33 }
 0x13d   :  { %v466_v37 = vsub.f32 %v1420_v25, %v464_v35  ;;  %v1165_v25 = vld [vmem:[%s1488_s3 + $0x80] sm:$0xff]  }
 0x13e   :  { %1105 = vmatpush3.bf16.msra.mxu1 %v1162_v34 }
 0x13f   :  { %v475_v40 = vrot.slane %v466_v37, %v168_v9  ;;  %1106 = vmatprep.subr.bf16.mxu1 %v1172_v0 }
 0x141   :  { %v476_v41 = vadd.f32 %v475_v40, %v471_v39 }
 0x142   :  { %1107 = vmatpush3.bf16.msra.mxu1 %v1163_v38 }
 0x143   :  { %v477_v47 = vpack.c.bf16 %v476_v41, %v476_v41  ;;  %1108 = vmatprep.subr.bf16.mxu1 %v1172_v0 }
 0x145   :  { %479 = vst [vmem:[#allocation2 + $0x8] sm:$0xf] %v477_v47 }
 0x146   :  { %1109 = vmatpush3.bf16.msra.mxu1 %v1164_v42 }
 0x147   :  { %1110 = vmatprep.subr.bf16.mxu1 %v1172_v0 }
 0x14a   :  { %1111 = vmatpush3.bf16.msra.mxu1 %v1165_v25 }
 0x14c   :  { %v706_v33 = vld [vmem:[#allocation2 + $0x8] sm:$0xf] }
 0x14d   :  { %1113 = vmatmul.mubr.bf16.vlgmr.msra.gmra.mxu1 %v706_v33 }
 0x1ed   :  { %v587_v49 = vpop.f32.mrf.mxu1 }
 0x1ee   :  { %v593_v44 = vpack.c.bf16 %v587_v49, %v587_v49  ;;  %v696_v51 = vpop.f32.mrf.mxu0 }
 0x1ef   :  { %v702_v52 = vpack.c.bf16 %v696_v51, %v696_v51  ;;  %v1074_v54 = vpop.f32.mrf.mxu1 }
 0x1f0   :  { %594 = vst [vmem:[%s1491_s5] sm:$0xf] %v593_v44  ;;  %v1094_v55 = vpop.f32.mrf.mxu0 }
 0x1f1   :  { %916 = vst [vmem:[%s1491_s5 + $0x4] sm:$0xf] %v702_v52  ;;  %v590_v56 = vpop.f32.mrf.mxu1 }
 0x1f2   :  { %v699_v57 = vpop.f32.mrf.mxu0 }
 0x1f3   :  { %v1075_v0 = vpop.f32.mrf.mxu1 }
 0x1f4   :  { %v1095_v58 = vpop.f32.mrf.mxu0 }
 0x20d   :  { %v806_v59 = vpop.f32.mrf.mxu1 }
 0x20e   :  { %v812_v60 = vpack.c.bf16 %v806_v59, %v806_v59 }
 0x20f   :  { %v1114_v61 = vpop.f32.mrf.mxu1 }
 0x210   :  { %941 = vst [vmem:[%s1491_s5 + $0x8] sm:$0xf] %v812_v60 }
 0x211   :  { %v809_v62 = vpop.f32.mrf.mxu1 }
 0x213   :  { %v1115_v63 = vpop.f32.mrf.mxu1 }

// kernel: part_based_forward.4
= control target key start
LH: loop header
LB: loop body
LE: loop exit
PB: predicated region body
PF: predicated region fallthrough
CT: control target
= control target key end

     0   :  { %11 = vsyncpa [#allocation4], 0  ;;  %s1564_s18 = smov [#allocation3]   ;;  %s1921_s0 = inlined_call_operand.vmem [shape: bf16[4,8,128], index: 0, kind: input, shape index: {}]   ;;  %s1922_s1 = inlined_call_operand.vmem [shape: bf16[4,128,128], index: 1, kind: input, shape index: {}]   ;;  %s1923_s2 = inlined_call_operand.vmem [shape: f32[4,3,128], index: 2, kind: input, shape index: {}]   ;;  %s1924_s3 = inlined_call_operand.hbm [shape: bf16[4,128,128], index: 3, kind: input, shape index: {}]   ;;  %s1925_s4 = inlined_call_operand.vmem [shape: bf16[4,8,128], index: 4, kind: output, shape index: {0}]   ;;  %s1926_s5 = inlined_call_operand.vmem [shape: bf16[4,8,128], index: 5, kind: output, shape index: {1}]  }
   0x1   :  { %s23_s19 = sshll.u32 %s1564_s18, 4  ;;  %s24_s19 = int_to_ptr.vmem [resolvable:$true] %s23_s19 }
   0x2   :  { %s1550_s20 = scalar_lea.vmem %s24_s19, 4096  ;;  %p1555_p1 = scmp.lt.s32.totalorder %s24_s19, %s24_s19 }
   0x3   :  { %p1551_p0 = scmp.ne.s32.totalorder %s24_s19, %s1550_s20  ;;  %p1556_p2 = scmp.lt.s32.totalorder %s1550_s20, %s1550_s20 }
   0x5   :  { %p1557_p3 = por %p1556_p2, %p1555_p1 }
   0x7   :  { %p1558_p4 = pnand %p1557_p3, %p1551_p0 }
   0x9   :  { %1561 = shalt.err (!%p1558_p4)
}
   0xa   :  { %s1565_s21 = smov 64   ;;  %s1566_s22 = smov 4  }
   0xb   :  { %29 = dma.hbm_to_vmem [thread:$0]  %s1924_s3, 4096, %s24_s19, [#allocation4], %s1565_s21, %s1565_s21, %s1566_s22  }
   0xc   :  { %1562 = dma.done.wait [#allocation4], 4096  }
   0xd   :  { %1563 = vsyncadd [#allocation4], 4294963200  ;;  %v1567_v0 = vmov 0.0   ;;  %vm1568_vm0 = vmmov 0   ;;  %v1470_v1 = vld [vmem:[%s1922_s1 + $0x38] sm:$0xff]   ;;  %v1472_v3 = vld [vmem:[%s1922_s1 + $0x30] sm:$0xff]   ;;  %v38_v53 = vlaneseq }
   0xe   :  { %1305 = vmatprep.subr.bf16.mxu0 %v1567_v0  ;;  %1325 = vmatprep.subr.bf16.mxu1 %v1567_v0  ;;  %v1471_v2 = vld [vmem:[%s1922_s1 + $0x78] sm:$0xff]   ;;  %v1473_v4 = vld [vmem:[%s1922_s1 + $0x70] sm:$0xff]   ;;  %v1474_v5 = vld [vmem:[%s1922_s1 + $0x28] sm:$0xff]  }
   0xf   :  { %1321 = vmatprep.mubr.msk.bf16.mxu0 %vm1568_vm0, %v1567_v0  ;;  %1341 = vmatprep.mubr.msk.bf16.mxu1 %vm1568_vm0, %v1567_v0  ;;  %v1475_v6 = vld [vmem:[%s1922_s1 + $0x68] sm:$0xff]   ;;  %v1476_v7 = vld [vmem:[%s1922_s1 + $0x20] sm:$0xff]   ;;  %v1478_v9 = vld [vmem:[%s1922_s1 + $0x18] sm:$0xff]   ;;  %v1772_v54 = vshrl.u32 %v38_v53, 7 }
  0x10   :  { %1306 = vmatpush3.bf16.msra.mxu0 %v1470_v1  ;;  %1326 = vmatpush3.bf16.msra.mxu1 %v1471_v2  ;;  %v1477_v8 = vld [vmem:[%s1922_s1 + $0x60] sm:$0xff]   ;;  %v1479_v10 = vld [vmem:[%s1922_s1 + $0x58] sm:$0xff]   ;;  %v1480_v11 = vld [vmem:[%s1922_s1 + $0x10] sm:$0xff]  }
  0x11   :  { %1307 = vmatprep.subr.bf16.mxu0 %v1567_v0  ;;  %1327 = vmatprep.subr.bf16.mxu1 %v1567_v0  ;;  %v1481_v12 = vld [vmem:[%s1922_s1 + $0x50] sm:$0xff]   ;;  %v1482_v13 = vld [vmem:[%s1922_s1 + $0x8] sm:$0xff]   ;;  %v1484_v15 = vld [vmem:[%s1922_s1] sm:$0xff]   ;;  %v1775_v55 = vsub.s32 0, %v1772_v54  ;;  %vm40_vm1 = vcmp.lt.s32.totalorder %v1772_v54, 4 }
  0x12   :  { %v1483_v14 = vld [vmem:[%s1922_s1 + $0x48] sm:$0xff]   ;;  %v1485_v16 = vld [vmem:[%s1922_s1 + $0x40] sm:$0xff]   ;;  %v1486_v19 = vld [vmem:[%s1922_s1 + $0xb8] sm:$0xff]   ;;  %v1791_v59 = vsel %vm40_vm1, 1.0, %v1567_v0 }
  0x13   :  { %v43_v17 = vld [vmem:[%s1921_s0] sm:$0xf]  ;;  %v1117_v18 = vld [vmem:[%s1921_s0 + $0x4] sm:$0xf]  ;;  %v1487_v20 = vld [vmem:[%s1922_s1 + $0xf8] sm:$0xff]  }
  0x14   :  { %1308 = vmatpush3.bf16.msra.mxu0 %v1472_v3  ;;  %1328 = vmatpush3.bf16.msra.mxu1 %v1473_v4  ;;  %v1488_v21 = vld [vmem:[%s1922_s1 + $0xb0] sm:$0xff]   ;;  %v1490_v23 = vld [vmem:[%s1922_s1 + $0xa8] sm:$0xff]   ;;  %v1492_v25 = vld [vmem:[%s1922_s1 + $0xa0] sm:$0xff]  }
  0x15   :  { %1309 = vmatprep.subr.bf16.mxu0 %v1567_v0  ;;  %1329 = vmatprep.subr.bf16.mxu1 %v1567_v0  ;;  %v1489_v22 = vld [vmem:[%s1922_s1 + $0xf0] sm:$0xff]   ;;  %v1491_v24 = vld [vmem:[%s1922_s1 + $0xe8] sm:$0xff]   ;;  %v1493_v26 = vld [vmem:[%s1922_s1 + $0xe0] sm:$0xff]  }
  0x16   :  { %v1494_v27 = vld [vmem:[%s1922_s1 + $0x98] sm:$0xff]   ;;  %v1496_v29 = vld [vmem:[%s1922_s1 + $0x90] sm:$0xff]   ;;  %v1498_v31 = vld [vmem:[%s1922_s1 + $0x88] sm:$0xff]  }
  0x17   :  { %v1495_v28 = vld [vmem:[%s1922_s1 + $0xd8] sm:$0xff]   ;;  %v1497_v30 = vld [vmem:[%s1922_s1 + $0xd0] sm:$0xff]   ;;  %v1499_v32 = vld [vmem:[%s1922_s1 + $0xc8] sm:$0xff]  }
  0x18   :  { %1310 = vmatpush3.bf16.msra.mxu0 %v1474_v5  ;;  %1330 = vmatpush3.bf16.msra.mxu1 %v1475_v6  ;;  %v1500_v33 = vld [vmem:[%s1922_s1 + $0x80] sm:$0xff]   ;;  %v1144_v35 = vld [vmem:[%s1921_s0 + $0x8] sm:$0xf]  ;;  %v1171_v36 = vld [vmem:[%s1921_s0 + $0xc] sm:$0xf] }
  0x19   :  { %1311 = vmatprep.subr.bf16.mxu0 %v1567_v0  ;;  %1331 = vmatprep.subr.bf16.mxu1 %v1567_v0  ;;  %v1501_v34 = vld [vmem:[%s1922_s1 + $0xc0] sm:$0xff]   ;;  %v1502_v37 = vld [vmem:[#allocation3 + $0x38] sm:$0xff]   ;;  %v1506_v41 = vld [vmem:[#allocation3 + $0x28] sm:$0xff]  }
  0x1a   :  { %v1503_v38 = vld [vmem:[#allocation3 + $0x78] sm:$0xff]   ;;  %v1504_v39 = vld [vmem:[#allocation3 + $0x30] sm:$0xff]   ;;  %v1507_v42 = vld [vmem:[#allocation3 + $0x68] sm:$0xff]  }
  0x1b   :  { %v1505_v40 = vld [vmem:[#allocation3 + $0x70] sm:$0xff]   ;;  %v1508_v43 = vld [vmem:[#allocation3 + $0x20] sm:$0xff]   ;;  %v1510_v45 = vld [vmem:[#allocation3 + $0x18] sm:$0xff]  }
  0x1c   :  { %1312 = vmatpush3.bf16.msra.mxu0 %v1476_v7  ;;  %1332 = vmatpush3.bf16.msra.mxu1 %v1477_v8  ;;  %v1509_v44 = vld [vmem:[#allocation3 + $0x60] sm:$0xff]   ;;  %v1511_v46 = vld [vmem:[#allocation3 + $0x58] sm:$0xff]   ;;  %v1512_v47 = vld [vmem:[#allocation3 + $0x10] sm:$0xff]  }
  0x1d   :  { %1313 = vmatprep.subr.bf16.mxu0 %v1567_v0  ;;  %1333 = vmatprep.subr.bf16.mxu1 %v1567_v0  ;;  %v1513_v48 = vld [vmem:[#allocation3 + $0x50] sm:$0xff]   ;;  %v1514_v49 = vld [vmem:[#allocation3 + $0x8] sm:$0xff]   ;;  %v1516_v51 = vld [vmem:[#allocation3] sm:$0xff]  }
  0x1e   :  { %v1515_v50 = vld [vmem:[#allocation3 + $0x48] sm:$0xff]   ;;  %v1517_v52 = vld [vmem:[#allocation3 + $0x40] sm:$0xff]   ;;  %v1780_v56 = vld [vmem:[%s1923_s2] sm:$0x7] }
  0x1f   :  { %v1786_v57 = vld [vmem:[%s1923_s2 + $0x4] sm:$0x7]  ;;  %v190_v58 = vrot.slane %v1780_v56, %v1775_v55 }
  0x20   :  { %1314 = vmatpush3.bf16.msra.mxu0 %v1478_v9  ;;  %1334 = vmatpush3.bf16.msra.mxu1 %v1479_v10  ;;  %v345_v60 = vrot.slane %v1786_v57, %v1775_v55 }
  0x21   :  { %1315 = vmatprep.subr.bf16.mxu0 %v1567_v0  ;;  %1335 = vmatprep.subr.bf16.mxu1 %v1567_v0 }
  0x24   :  { %1316 = vmatpush3.bf16.msra.mxu0 %v1480_v11  ;;  %1336 = vmatpush3.bf16.msra.mxu1 %v1481_v12 }
  0x25   :  { %1317 = vmatprep.subr.bf16.mxu0 %v1567_v0  ;;  %1337 = vmatprep.subr.bf16.mxu1 %v1567_v0 }
  0x28   :  { %1318 = vmatpush3.bf16.msra.mxu0 %v1482_v13  ;;  %1338 = vmatpush3.bf16.msra.mxu1 %v1483_v14 }
  0x29   :  { %1319 = vmatprep.subr.bf16.mxu0 %v1567_v0  ;;  %1339 = vmatprep.subr.bf16.mxu1 %v1567_v0 }
  0x2c   :  { %1320 = vmatpush3.bf16.msra.mxu0 %v1484_v15  ;;  %1340 = vmatpush3.bf16.msra.mxu1 %v1485_v16 }
  0x2d   :  { %1345 = vmatprep.subr.bf16.mxu0 %v1567_v0  ;;  %1365 = vmatprep.subr.bf16.mxu1 %v1567_v0 }
  0x2f   :  { %1322 = vmatmul.mubr.bf16.vlgmr.msra.gmra.mxu0 %v43_v17  ;;  %1342 = vmatmul.mubr.bf16.vlgmr.msra.gmra.mxu1 %v1117_v18 }
  0x30   :  { %1346 = vmatpush3.bf16.msra.mxu0 %v1486_v19  ;;  %1366 = vmatpush3.bf16.msra.mxu1 %v1487_v20 }
  0x31   :  { %1347 = vmatprep.subr.bf16.mxu0 %v1567_v0  ;;  %1367 = vmatprep.subr.bf16.mxu1 %v1567_v0 }
  0x32   :  { %1361 = vmatprep.mubr.msk.bf16.mxu0 %vm1568_vm0, %v1567_v0  ;;  %1381 = vmatprep.mubr.msk.bf16.mxu1 %vm1568_vm0, %v1567_v0 }
  0x34   :  { %1348 = vmatpush3.bf16.msra.mxu0 %v1488_v21  ;;  %1368 = vmatpush3.bf16.msra.mxu1 %v1489_v22 }
  0x35   :  { %1349 = vmatprep.subr.bf16.mxu0 %v1567_v0  ;;  %1369 = vmatprep.subr.bf16.mxu1 %v1567_v0 }
  0x38   :  { %1350 = vmatpush3.bf16.msra.mxu0 %v1490_v23  ;;  %1370 = vmatpush3.bf16.msra.mxu1 %v1491_v24 }
  0x39   :  { %1351 = vmatprep.subr.bf16.mxu0 %v1567_v0  ;;  %1371 = vmatprep.subr.bf16.mxu1 %v1567_v0 }
  0x3c   :  { %1352 = vmatpush3.bf16.msra.mxu0 %v1492_v25  ;;  %1372 = vmatpush3.bf16.msra.mxu1 %v1493_v26 }
  0x3d   :  { %1353 = vmatprep.subr.bf16.mxu0 %v1567_v0  ;;  %1373 = vmatprep.subr.bf16.mxu1 %v1567_v0 }
  0x40   :  { %1354 = vmatpush3.bf16.msra.mxu0 %v1494_v27  ;;  %1374 = vmatpush3.bf16.msra.mxu1 %v1495_v28 }
  0x41   :  { %1355 = vmatprep.subr.bf16.mxu0 %v1567_v0  ;;  %1375 = vmatprep.subr.bf16.mxu1 %v1567_v0 }
  0x44   :  { %1356 = vmatpush3.bf16.msra.mxu0 %v1496_v29  ;;  %1376 = vmatpush3.bf16.msra.mxu1 %v1497_v30 }
  0x45   :  { %1357 = vmatprep.subr.bf16.mxu0 %v1567_v0  ;;  %1377 = vmatprep.subr.bf16.mxu1 %v1567_v0 }
  0x48   :  { %1358 = vmatpush3.bf16.msra.mxu0 %v1498_v31  ;;  %1378 = vmatpush3.bf16.msra.mxu1 %v1499_v32 }
  0x49   :  { %1359 = vmatprep.subr.bf16.mxu0 %v1567_v0  ;;  %1379 = vmatprep.subr.bf16.mxu1 %v1567_v0 }
  0x4c   :  { %1360 = vmatpush3.bf16.msra.mxu0 %v1500_v33  ;;  %1380 = vmatpush3.bf16.msra.mxu1 %v1501_v34 }
  0x4d   :  { %1385 = vmatprep.subr.bf16.mxu0 %v1567_v0  ;;  %1405 = vmatprep.subr.bf16.mxu1 %v1567_v0 }
  0x4f   :  { %1362 = vmatmul.mubr.bf16.vlgmr.msra.gmra.mxu0 %v1144_v35  ;;  %1382 = vmatmul.mubr.bf16.vlgmr.msra.gmra.mxu1 %v1171_v36  ;;  %v1824_v36 = vld [vmem:[%s1923_s2 + $0x8] sm:$0x7] }
  0x50   :  { %1401 = vmatprep.mubr.msk.bf16.mxu0 %vm1568_vm0, %v1567_v0  ;;  %1421 = vmatprep.mubr.msk.bf16.mxu1 %vm1568_vm0, %v1567_v0 }
  0x51   :  { %1386 = vmatpush3.bf16.msra.mxu0 %v1502_v37  ;;  %1406 = vmatpush3.bf16.msra.mxu1 %v1503_v38  ;;  %v1829_v38 = vld [vmem:[%s1923_s2 + $0xc] sm:$0x7] }
  0x52   :  { %1387 = vmatprep.subr.bf16.mxu0 %v1567_v0  ;;  %1407 = vmatprep.subr.bf16.mxu1 %v1567_v0 }
  0x55   :  { %1388 = vmatpush3.bf16.msra.mxu0 %v1504_v39  ;;  %1408 = vmatpush3.bf16.msra.mxu1 %v1505_v40 }
  0x56   :  { %1389 = vmatprep.subr.bf16.mxu0 %v1567_v0  ;;  %1409 = vmatprep.subr.bf16.mxu1 %v1567_v0 }
  0x59   :  { %1390 = vmatpush3.bf16.msra.mxu0 %v1506_v41  ;;  %1410 = vmatpush3.bf16.msra.mxu1 %v1507_v42  ;;  %v501_v41 = vrot.slane %v1824_v36, %v1775_v55 }
  0x5a   :  { %1391 = vmatprep.subr.bf16.mxu0 %v1567_v0  ;;  %1411 = vmatprep.subr.bf16.mxu1 %v1567_v0 }
  0x5d   :  { %1392 = vmatpush3.bf16.msra.mxu0 %v1508_v43  ;;  %1412 = vmatpush3.bf16.msra.mxu1 %v1509_v44  ;;  %v657_v43 = vrot.slane %v1829_v38, %v1775_v55 }
  0x5e   :  { %1393 = vmatprep.subr.bf16.mxu0 %v1567_v0  ;;  %1413 = vmatprep.subr.bf16.mxu1 %v1567_v0 }
  0x61   :  { %1394 = vmatpush3.bf16.msra.mxu0 %v1510_v45  ;;  %1414 = vmatpush3.bf16.msra.mxu1 %v1511_v46 }
  0x62   :  { %1395 = vmatprep.subr.bf16.mxu0 %v1567_v0  ;;  %1415 = vmatprep.subr.bf16.mxu1 %v1567_v0 }
  0x65   :  { %1396 = vmatpush3.bf16.msra.mxu0 %v1512_v47  ;;  %1416 = vmatpush3.bf16.msra.mxu1 %v1513_v48 }
  0x66   :  { %1397 = vmatprep.subr.bf16.mxu0 %v1567_v0  ;;  %1417 = vmatprep.subr.bf16.mxu1 %v1567_v0 }
  0x69   :  { %1398 = vmatpush3.bf16.msra.mxu0 %v1514_v49  ;;  %1418 = vmatpush3.bf16.msra.mxu1 %v1515_v50 }
  0x6a   :  { %1399 = vmatprep.subr.bf16.mxu0 %v1567_v0  ;;  %1419 = vmatprep.subr.bf16.mxu1 %v1567_v0 }
  0x6d   :  { %1400 = vmatpush3.bf16.msra.mxu0 %v1516_v51  ;;  %1420 = vmatpush3.bf16.msra.mxu1 %v1517_v52 }
  0x6e   :  { %1425 = vmatprep.subr.bf16.mxu0 %v1567_v0  ;;  %1445 = vmatprep.subr.bf16.mxu1 %v1567_v0 }
  0xef   :  { %v1795_v61 = vpop.f32.mrf.mxu0  ;;  %v1800_v1 = vpop.f32.mrf.mxu1 }
  0xf0   :  { %v149_v62 = vmul.f32 %v1791_v59, %v1795_v61  ;;  %v191_v63 = vadd.f32 %v190_v58, %v1795_v61  ;;  %v303_v2 = vmul.f32 %v1791_v59, %v1800_v1  ;;  %v346_v3 = vadd.f32 %v345_v60, %v1800_v1 }
  0xf1   :  { %v1323_v4 = vpop.f32.mrf.mxu0  ;;  %v1343_v7 = vpop.f32.mrf.mxu1 }
  0xf2   :  { %v150_v5 = vrot.slane %v149_v62, 4  ;;  %v192_v6 = vpack.c.bf16 %v191_v63, %v191_v63  ;;  %v304_v8 = vrot.slane %v303_v2, 4  ;;  %v347_v9 = vpack.c.bf16 %v346_v3, %v346_v3 }
  0xf3   :  { %v145_v10 = vpop.f32.mrf.mxu0  ;;  %v298_v12 = vpop.f32.mrf.mxu1 }
  0xf4   :  { %v151_v11 = vadd.f32 %v150_v5, %v149_v62  ;;  %193 = vst [vmem:[%s1925_s4] sm:$0xf] %v192_v6  ;;  %v305_v13 = vadd.f32 %v304_v8, %v303_v2  ;;  %1143 = vst [vmem:[%s1925_s4 + $0x4] sm:$0xf] %v347_v9 }
  0xf5   :  { %v1324_v14 = vpop.f32.mrf.mxu0  ;;  %v1344_v16 = vpop.f32.mrf.mxu1 }
  0xf6   :  { %v152_v15 = vrot.slane %v151_v11, 2  ;;  %v306_v17 = vrot.slane %v305_v13, 2 }
  0xf8   :  { %v153_v18 = vadd.f32 %v152_v15, %v151_v11  ;;  %v307_v19 = vadd.f32 %v306_v17, %v305_v13 }
  0xfa   :  { %v154_v20 = vrot.slane %v153_v18, 1  ;;  %v308_v21 = vrot.slane %v307_v19, 1 }
  0xfc   :  { %v155_v22 = vadd.f32 %v154_v20, %v153_v18  ;;  %v309_v23 = vadd.f32 %v308_v21, %v307_v19 }
  0xfe   :  { %v1811_v24 = vmul.f32 0.25, %v155_v22  ;;  %v1813_v25 = vmul.f32 0.25, %v309_v23 }
 0x100   :  { %v157_v26 = vsub.f32 %v1795_v61, %v1811_v24  ;;  %v311_v27 = vsub.f32 %v1800_v1, %v1813_v25 }
 0x102   :  { %v158_v28 = vmul.f32 %v1791_v59, %v157_v26  ;;  %v312_v29 = vmul.f32 %v1791_v59, %v311_v27 }
 0x104   :  { %v159_v30 = vmul.f32 %v158_v28, %v158_v28  ;;  %v313_v31 = vmul.f32 %v312_v29, %v312_v29 }
 0x106   :  { %v160_v32 = vrot.slane %v159_v30, 4  ;;  %v314_v33 = vrot.slane %v313_v31, 4 }
 0x108   :  { %v161_v34 = vadd.f32 %v160_v32, %v159_v30  ;;  %v315_v35 = vadd.f32 %v314_v33, %v313_v31  ;;  %v1863_v32 = vsub.s32 1, %v1772_v54 }
 0x10a   :  { %v162_v37 = vrot.slane %v161_v34, 2  ;;  %v316_v39 = vrot.slane %v315_v35, 2 }
 0x10c   :  { %v163_v40 = vadd.f32 %v162_v37, %v161_v34  ;;  %v317_v42 = vadd.f32 %v316_v39, %v315_v35 }
 0x10e   :  { %v164_v44 = vrot.slane %v163_v40, 1  ;;  %v318_v45 = vrot.slane %v317_v42, 1 }
 0x10f   :  { %v1835_v46 = vpop.f32.mrf.mxu0  ;;  %v1840_v50 = vpop.f32.mrf.mxu1 }
 0x110   :  { %v165_v47 = vadd.f32 %v164_v44, %v163_v40  ;;  %v459_v48 = vmul.f32 %v1791_v59, %v1835_v46  ;;  %v502_v49 = vadd.f32 %v501_v41, %v1835_v46  ;;  %v319_v51 = vadd.f32 %v318_v45, %v317_v42 }
 0x111   :  { %v615_v52 = vmul.f32 %v1791_v59, %v1840_v50  ;;  %v658_v53 = vadd.f32 %v657_v43, %v1840_v50  ;;  %v1363_v58 = vpop.f32.mrf.mxu0  ;;  %v1383_v63 = vpop.f32.mrf.mxu1 }
 0x112   :  { %v166_v55 = vmul.f32 0.25, %v165_v47  ;;  %v460_v60 = vrot.slane %v459_v48, 4  ;;  %v503_v62 = vpack.c.bf16 %v502_v49, %v502_v49  ;;  %v320_v2 = vmul.f32 0.25, %v319_v51 }
 0x113   :  { %v616_v3 = vrot.slane %v615_v52, 4  ;;  %v659_v4 = vpack.c.bf16 %v658_v53, %v658_v53  ;;  %v454_v5 = vpop.f32.mrf.mxu0  ;;  %v610_v8 = vpop.f32.mrf.mxu1 }
 0x114   :  { %v167_v6 = vadd.f32 1e-05, %v166_v55  ;;  %v461_v7 = vadd.f32 %v460_v60, %v459_v48  ;;  %1170 = vst [vmem:[%s1925_s4 + $0x8] sm:$0xf] %v503_v62  ;;  %v321_v9 = vadd.f32 1e-05, %v320_v2 }
 0x115   :  { %v617_v10 = vadd.f32 %v616_v3, %v615_v52  ;;  %1197 = vst [vmem:[%s1925_s4 + $0xc] sm:$0xf] %v659_v4  ;;  %v1364_v11 = vpop.f32.mrf.mxu0  ;;  %v1384_v13 = vpop.f32.mrf.mxu1 }
 0x116   :  { %1534 = vrsqrt.f32 %v167_v6  ;;  %v462_v12 = vrot.slane %v461_v7, 2  ;;  %v1521_v13 = vld [vmem:[#allocation3 + $0xf0] sm:$0xff]  }
 0x117   :  { %1536 = vrsqrt.f32 %v321_v9  ;;  %v618_v14 = vrot.slane %v617_v10, 2  ;;  %v1519_v9 = vld [vmem:[#allocation3 + $0xf8] sm:$0xff]  }
 0x118   :  { %v463_v15 = vadd.f32 %v462_v12, %v461_v7  ;;  %v1520_v12 = vld [vmem:[#allocation3 + $0xb0] sm:$0xff]  }
 0x119   :  { %v619_v16 = vadd.f32 %v618_v14, %v617_v10  ;;  %v1522_v14 = vld [vmem:[#allocation3 + $0xa8] sm:$0xff]  }
 0x11a   :  { %v464_v17 = vrot.slane %v463_v15, 1 }
 0x11b   :  { %v620_v18 = vrot.slane %v619_v16, 1 }
 0x11c   :  { %v465_v19 = vadd.f32 %v464_v17, %v463_v15  ;;  %v1523_v15 = vld [vmem:[#allocation3 + $0xe8] sm:$0xff]   ;;  %v1524_v17 = vld [vmem:[#allocation3 + $0xa0] sm:$0xff]  }
 0x11d   :  { %v621_v20 = vadd.f32 %v620_v18, %v619_v16 }
 0x11e   :  { %v1851_v21 = vmul.f32 0.25, %v465_v19 }
 0x11f   :  { %v1853_v22 = vmul.f32 0.25, %v621_v20  ;;  %v1525_v20 = vld [vmem:[#allocation3 + $0xe0] sm:$0xff]  }
 0x120   :  { %v467_v23 = vsub.f32 %v1835_v46, %v1851_v21 }
 0x121   :  { %v623_v26 = vsub.f32 %v1840_v50, %v1853_v22 }
 0x122   :  { %v468_v27 = vmul.f32 %v1791_v59, %v467_v23 }
 0x123   :  { %v1535_v28 = vpop.eup %1534  ;;  %v624_v29 = vmul.f32 %v1791_v59, %v623_v26  ;;  %v1870_v59 = vsub.s32 2, %v1772_v54 }
 0x124   :  { %v1537_v30 = vpop.eup %1536  ;;  %v169_v31 = vmul.f32 %v1535_v28, %v1780_v56  ;;  %v469_v33 = vmul.f32 %v468_v27, %v468_v27  ;;  %v1526_v28 = vld [vmem:[#allocation3 + $0x98] sm:$0xff]  }
 0x125   :  { %v323_v34 = vmul.f32 %v1537_v30, %v1786_v57  ;;  %v625_v35 = vmul.f32 %v624_v29, %v624_v29 }
 0x126   :  { %v170_v37 = vmul.f32 %v169_v31, %v1811_v24  ;;  %v470_v39 = vrot.slane %v469_v33, 4  ;;  %v178_v43 = vrot.slane %v169_v31, %v1863_v32  ;;  %v1527_v31 = vld [vmem:[#allocation3 + $0xd8] sm:$0xff]  }
 0x127   :  { %v324_v40 = vmul.f32 %v323_v34, %v1813_v25  ;;  %v626_v41 = vrot.slane %v625_v35, 4  ;;  %v332_v47 = vrot.slane %v323_v34, %v1863_v32 }
 0x128   :  { %v172_v42 = vrot.slane %v170_v37, 7  ;;  %v471_v44 = vadd.f32 %v470_v39, %v469_v33  ;;  %v179_v25 = vmul.f32 %v178_v43, %v1795_v61 }
 0x129   :  { %v326_v45 = vrot.slane %v324_v40, 7  ;;  %v627_v48 = vadd.f32 %v626_v41, %v625_v35  ;;  %v333_v55 = vmul.f32 %v332_v47, %v1800_v1  ;;  %v1518_v1 = vld [vmem:[#allocation3 + $0xb8] sm:$0xff]   ;;  %v1529_v40 = vld [vmem:[#allocation3 + $0xd0] sm:$0xff]  }
 0x12a   :  { %v174_v49 = vsub.f32 %v1780_v56, %v172_v42  ;;  %v472_v51 = vrot.slane %v471_v44, 2 }
 0x12b   :  { %v328_v24 = vsub.f32 %v1786_v57, %v326_v45  ;;  %v628_v52 = vrot.slane %v627_v48, 2 }
 0x12c   :  { %v183_v53 = vrot.slane %v174_v49, %v1870_v59  ;;  %v473_v58 = vadd.f32 %v472_v51, %v471_v44 }
 0x12d   :  { %v337_v54 = vrot.slane %v328_v24, %v1870_v59  ;;  %v629_v60 = vadd.f32 %v628_v52, %v627_v48 }
 0x12e   :  { %v184_v62 = vadd.f32 %v183_v53, %v179_v25  ;;  %v474_v63 = vrot.slane %v473_v58, 1 }
 0x12f   :  { %v338_v2 = vadd.f32 %v337_v54, %v333_v55  ;;  %v630_v3 = vrot.slane %v629_v60, 1 }
 0x130   :  { %v185_v4 = vpack.c.bf16 %v184_v62, %v184_v62  ;;  %v475_v56 = vadd.f32 %v474_v63, %v473_v58 }
 0x131   :  { %v339_v5 = vpack.c.bf16 %v338_v2, %v338_v2  ;;  %v631_v6 = vadd.f32 %v630_v3, %v629_v60 }
 0x132   :  { %186 = vst [vmem:[#allocation2] sm:$0xf] %v185_v4  ;;  %v476_v57 = vmul.f32 0.25, %v475_v56 }
 0x133   :  { %341 = vst [vmem:[#allocation2 + $0x4] sm:$0xf] %v339_v5  ;;  %v632_v61 = vmul.f32 0.25, %v631_v6 }
 0x134   :  { %v477_v7 = vadd.f32 1e-05, %v476_v57 }
 0x135   :  { %v633_v8 = vadd.f32 1e-05, %v632_v61 }
 0x136   :  { %1538 = vrsqrt.f32 %v477_v7 }
 0x137   :  { %1540 = vrsqrt.f32 %v633_v8 }
 0x139   :  { %v662_v10 = vld [vmem:[#allocation2] sm:$0xf] }
 0x13a   :  { %1402 = vmatmul.mubr.bf16.vlgmr.msra.gmra.mxu0 %v662_v10  ;;  %v770_v11 = vld [vmem:[#allocation2 + $0x4] sm:$0xf] }
 0x13b   :  { %1422 = vmatmul.mubr.bf16.vlgmr.msra.gmra.mxu1 %v770_v11  ;;  %1426 = vmatpush3.bf16.msra.mxu0 %v1518_v1 }
 0x13c   :  { %1446 = vmatpush3.bf16.msra.mxu1 %v1519_v9  ;;  %1427 = vmatprep.subr.bf16.mxu0 %v1567_v0 }
 0x13d   :  { %1447 = vmatprep.subr.bf16.mxu1 %v1567_v0  ;;  %1441 = vmatprep.mubr.msk.bf16.mxu0 %vm1568_vm0, %v1567_v0 }
 0x13e   :  { %1461 = vmatprep.mubr.msk.bf16.mxu1 %vm1568_vm0, %v1567_v0 }
 0x13f   :  { %1428 = vmatpush3.bf16.msra.mxu0 %v1520_v12 }
 0x140   :  { %1448 = vmatpush3.bf16.msra.mxu1 %v1521_v13  ;;  %1429 = vmatprep.subr.bf16.mxu0 %v1567_v0 }
 0x141   :  { %1449 = vmatprep.subr.bf16.mxu1 %v1567_v0 }
 0x143   :  { %v1539_v16 = vpop.eup %1538  ;;  %1430 = vmatpush3.bf16.msra.mxu0 %v1522_v14 }
 0x144   :  { %v1541_v18 = vpop.eup %1540  ;;  %v479_v19 = vmul.f32 %v1539_v16, %v1824_v36  ;;  %1450 = vmatpush3.bf16.msra.mxu1 %v1523_v15  ;;  %1431 = vmatprep.subr.bf16.mxu0 %v1567_v0 }
 0x145   :  { %v635_v23 = vmul.f32 %v1541_v18, %v1829_v38  ;;  %1451 = vmatprep.subr.bf16.mxu1 %v1567_v0 }
 0x146   :  { %v480_v26 = vmul.f32 %v479_v19, %v1851_v21  ;;  %v488_v30 = vrot.slane %v479_v19, %v1863_v32 }
 0x147   :  { %v636_v27 = vmul.f32 %v635_v23, %v1853_v22  ;;  %1432 = vmatpush3.bf16.msra.mxu0 %v1524_v17  ;;  %v644_v34 = vrot.slane %v635_v23, %v1863_v32  ;;  %v1528_v22 = vld [vmem:[#allocation3 + $0x90] sm:$0xff]  }
 0x148   :  { %v482_v29 = vrot.slane %v480_v26, 7  ;;  %1452 = vmatpush3.bf16.msra.mxu1 %v1525_v20  ;;  %1433 = vmatprep.subr.bf16.mxu0 %v1567_v0  ;;  %v489_v37 = vmul.f32 %v488_v30, %v1835_v46  ;;  %v1531_v46 = vld [vmem:[#allocation3 + $0xc8] sm:$0xff]  }
 0x149   :  { %v638_v33 = vrot.slane %v636_v27, 7  ;;  %1453 = vmatprep.subr.bf16.mxu1 %v1567_v0  ;;  %v645_v41 = vmul.f32 %v644_v34, %v1840_v50  ;;  %v1532_v50 = vld [vmem:[#allocation3 + $0x80] sm:$0xff]  }
 0x14a   :  { %v484_v35 = vsub.f32 %v1824_v36, %v482_v29 }
 0x14b   :  { %v640_v21 = vsub.f32 %v1829_v38, %v638_v33  ;;  %1434 = vmatpush3.bf16.msra.mxu0 %v1526_v28  ;;  %v1530_v38 = vld [vmem:[#allocation3 + $0x88] sm:$0xff]  }
 0x14c   :  { %v493_v39 = vrot.slane %v484_v35, %v1870_v59  ;;  %1454 = vmatpush3.bf16.msra.mxu1 %v1527_v31  ;;  %1435 = vmatprep.subr.bf16.mxu0 %v1567_v0 }
 0x14d   :  { %v649_v32 = vrot.slane %v640_v21, %v1870_v59  ;;  %1455 = vmatprep.subr.bf16.mxu1 %v1567_v0  ;;  %v1533_v59 = vld [vmem:[#allocation3 + $0xc0] sm:$0xff]  }
 0x14e   :  { %v494_v42 = vadd.f32 %v493_v39, %v489_v37 }
 0x14f   :  { %v650_v36 = vadd.f32 %v649_v32, %v645_v41  ;;  %1436 = vmatpush3.bf16.msra.mxu0 %v1528_v22 }
 0x150   :  { %v495_v43 = vpack.c.bf16 %v494_v42, %v494_v42  ;;  %1456 = vmatpush3.bf16.msra.mxu1 %v1529_v40  ;;  %1437 = vmatprep.subr.bf16.mxu0 %v1567_v0 }
 0x151   :  { %v651_v44 = vpack.c.bf16 %v650_v36, %v650_v36  ;;  %1457 = vmatprep.subr.bf16.mxu1 %v1567_v0 }
 0x152   :  { %497 = vst [vmem:[#allocation2 + $0x8] sm:$0xf] %v495_v43 }
 0x153   :  { %653 = vst [vmem:[#allocation2 + $0xc] sm:$0xf] %v651_v44  ;;  %1438 = vmatpush3.bf16.msra.mxu0 %v1530_v38 }
 0x154   :  { %1458 = vmatpush3.bf16.msra.mxu1 %v1531_v46  ;;  %1439 = vmatprep.subr.bf16.mxu0 %v1567_v0 }
 0x155   :  { %1459 = vmatprep.subr.bf16.mxu1 %v1567_v0 }
 0x157   :  { %1440 = vmatpush3.bf16.msra.mxu0 %v1532_v50 }
 0x158   :  { %1460 = vmatpush3.bf16.msra.mxu1 %v1533_v59 }
 0x159   :  { %v880_v45 = vld [vmem:[#allocation2 + $0x8] sm:$0xf] }
 0x15a   :  { %1442 = vmatmul.mubr.bf16.vlgmr.msra.gmra.mxu0 %v880_v45  ;;  %v990_v47 = vld [vmem:[#allocation2 + $0xc] sm:$0xf] }
 0x15b   :  { %1462 = vmatmul.mubr.bf16.vlgmr.msra.gmra.mxu1 %v990_v47 }
 0x1fa   :  { %v761_v48 = vpop.f32.mrf.mxu0 }
 0x1fb   :  { %v767_v49 = vpack.c.bf16 %v761_v48, %v761_v48  ;;  %v870_v51 = vpop.f32.mrf.mxu1 }
 0x1fc   :  { %v876_v24 = vpack.c.bf16 %v870_v51, %v870_v51  ;;  %v1403_v52 = vpop.f32.mrf.mxu0 }
 0x1fd   :  { %768 = vst [vmem:[%s1926_s5] sm:$0xf] %v767_v49  ;;  %v1423_v25 = vpop.f32.mrf.mxu1 }
 0x1fe   :  { %1214 = vst [vmem:[%s1926_s5 + $0x4] sm:$0xf] %v876_v24  ;;  %v764_v0 = vpop.f32.mrf.mxu0 }
 0x1ff   :  { %v873_v53 = vpop.f32.mrf.mxu1 }
 0x200   :  { %v1404_v58 = vpop.f32.mrf.mxu0 }
 0x201   :  { %v1424_v55 = vpop.f32.mrf.mxu1 }
 0x21a   :  { %v980_v54 = vpop.f32.mrf.mxu0 }
 0x21b   :  { %v986_v60 = vpack.c.bf16 %v980_v54, %v980_v54  ;;  %v1090_v62 = vpop.f32.mrf.mxu1 }
 0x21c   :  { %v1096_v63 = vpack.c.bf16 %v1090_v62, %v1090_v62  ;;  %v1443_v2 = vpop.f32.mrf.mxu0 }
 0x21d   :  { %1223 = vst [vmem:[%s1926_s5 + $0x8] sm:$0xf] %v986_v60  ;;  %v1463_v3 = vpop.f32.mrf.mxu1 }
 0x21e   :  { %1232 = vst [vmem:[%s1926_s5 + $0xc] sm:$0xf] %v1096_v63  ;;  %v983_v4 = vpop.f32.mrf.mxu0 }
 0x21f   :  { %v1093_v56 = vpop.f32.mrf.mxu1 }
 0x220   :  { %v1444_v5 = vpop.f32.mrf.mxu0 }
 0x221   :  { %v1464_v6 = vpop.f32.mrf.mxu1 }
 0x222   :  { %1107 = vsyncpa [#allocation4], 1 }

</bundles_post_ra>
